<compile_context>
chip_gen: v7x
topology: tpu7x:2x2x1
jax: 0.10.0
libtpu: 0.0.40
codegen_flags: <defaults>
</compile_context>

<pallas_src>
import functools

import jax
import jax.numpy as jnp
from jax import lax
from jax.experimental import pallas as pl
from jax.experimental.pallas import tpu as pltpu

_LANES = 128


def _round_up(x, m):
    return (x + m - 1) // m * m


def _vmem_budget_and_limit():
    """Per-generation live-VMEM budget for tile picking + explicit scoped limit."""
    kind = ""
    try:
        kind = jax.devices()[0].device_kind.lower()
    except Exception:
        pass
    if "v7" in kind:                  # 64 MiB physical / 32 MiB scoped default
        return 20 << 20, 44 << 20
    if "v5" in kind or "v6" in kind:  # 128 MiB physical
        return 28 << 20, 64 << 20
    return 20 << 20, 44 << 20         # unknown generation: stay conservative


_VMEM_BUDGET, _VMEM_LIMIT = _vmem_budget_and_limit()


def _pick_row_tile(h, wd, cpad, in_bytes, out_bytes, budget):
    """Largest even row tile TH whose real live VMEM fits the budget.

    Accounts for the double-buffered current/halo/weight/output blocks, the
    concatenated (TH+2)-row window copy, ~2 live shifted-tap matmul operands
    and the f32 accumulator (the items the previous estimate missed).
    """
    wpad = wd + 2
    cap = max(2, h // 2)   # >= 2 row tiles so (batch, row) grid feeds both v7x cores
    for th in (256, 128, 64, 32, 16, 8, 4, 2):
        if th > cap:
            continue
        live = (2 * th * wpad * cpad * in_bytes        # current rows, double-buffered
                + 2 * 2 * wpad * cpad * in_bytes       # 2-row halo, double-buffered
                + 2 * 9 * cpad * cpad * in_bytes       # per-tap weights, double-buffered
                + 2 * th * wd * cpad * out_bytes       # conv-out tile, double-buffered
                + (th + 2) * wpad * cpad * in_bytes    # concatenated window copy
                + 2 * th * wd * cpad * in_bytes        # ~2 live shifted-tap operands
                + th * wd * cpad * 4                   # f32 accumulator
                + 2 * 2 * cpad * 4)                    # stats tile
        if live <= budget:
            return th
    return 2


def _pick_pixel_tile(npix):
    """Lane-dense pixel block for phase 2 (multiple of 128 preferred)."""
    for p in (2048, 1024, 512, 256, 128):
        if npix % p == 0:
            return p
    if npix <= 2048:
        return npix        # whole pixel axis in one (small) block
    # TODO(synk): tail block of the cdiv grid relies on Pallas edge masking.
    return 128


# ---------------------------------------------------------------------------
# Phase 1: conv3x3 (no bias) + per-tile per-channel sum / sumsq partials
# ---------------------------------------------------------------------------
def _conv_stats_kernel(xc_ref, xh_ref, w_ref, o_ref, st_ref, *, valid_h):
    """One (batch, row-tile) grid step.

    xc_ref : (1, TH, W+2, C)   current padded input rows
    xh_ref : (1, 2,  W+2, C)   2-row bottom halo (rows TH..TH+1 of the window)
    w_ref  : (9, C, C)         per-tap weights, tap index = 3*dy + dx
    o_ref  : (1, TH, W, C)     conv output tile (bias dropped: BN cancels it)
    st_ref : (1, 1, 2, C)      per-tile [sum, sum-of-squares] over valid pixels
    """
    _, th, wpad, c = xc_ref.shape
    wd = wpad - 2

    # (TH+2, W+2, C) window: one small concat instead of re-reading a full
    # TH-row halo block from HBM.
    win = jnp.concatenate([xc_ref[0], xh_ref[0]], axis=0)

    # 9 shifted matmuls with K = C (C padded to a lane multiple) — no 9C-wide
    # im2col patch is ever materialized.  Accumulate in f32.
    acc = jnp.zeros((th * wd, c), jnp.float32)
    for dy in range(3):
        for dx in range(3):
            tap = win[dy:dy + th, dx:dx + wd, :].reshape(th * wd, c)
            acc += jnp.dot(tap, w_ref[3 * dy + dx],
                           preferred_element_type=jnp.float32)

    o_ref[...] = acc.reshape(1, th, wd, c).astype(o_ref.dtype)

    # One-pass BN partials in f32, masked to rows < H (row padding excluded).
    # TODO(synk): E[x^2]-E[x]^2 can cancel when |mean| >> std; a Welford-style
    # combine of the per-tile partials would be more robust.
    row = lax.broadcasted_iota(jnp.int32, (th, wd, 1), 0).reshape(th * wd, 1)
    valid = (row + pl.program_id(1) * th) < valid_h
    masked = jnp.where(valid, acc, 0.0)
    s = jnp.sum(masked, axis=0, keepdims=True)             # (1, C)
    sq = jnp.sum(masked * acc, axis=0, keepdims=True)      # (1, C) = sum(mask*x^2)
    st_ref[...] = jnp.concatenate([s, sq], axis=0).reshape(1, 1, 2, c)


# ---------------------------------------------------------------------------
# Phase 2: y = relu(x * s + t) with the NHWC->NCHW transpose fused in
# ---------------------------------------------------------------------------
def _bn_relu_nchw_kernel(x_ref, s_ref, t_ref, o_ref):
    """x_ref: (1, P, CB) pixels-major; s/t: (1, CB); o_ref: (1, CB, P) NCHW."""
    x = x_ref[0].astype(jnp.float32)                        # (P, CB)
    y = jnp.maximum(x * s_ref[...] + t_ref[...], 0.0)
    o_ref[...] = jnp.transpose(y, (1, 0)).reshape(o_ref.shape).astype(o_ref.dtype)


# ---------------------------------------------------------------------------
# Forward pass wrapper (NCHW in / NCHW out, matching the PyTorch module)
# ---------------------------------------------------------------------------
@functools.partial(jax.jit, static_argnames=("compute_dtype",))
def resnet_forward(x_nchw, conv_w_oihw, conv_b, bn_gamma, bn_beta,
                   *, compute_dtype=jnp.bfloat16):
    """Resnet block forward: (N, C, H, W) f32 -> (N, C, H, W) f32.

    compute_dtype: dtype of the MXU operands and of the conv-output
    intermediate in HBM (bf16 by default for perf; f32 is an exact check path).
    conv_b is accepted to mirror nn.Conv2d(bias=True) but is mathematically
    cancelled by training-mode BatchNorm mean subtraction, so it never reaches
    the kernels.
    TODO(synk): eval-mode BN (running stats) and the running_mean/running_var
    buffer updates are not modeled; they do not affect this training forward.
    """
    del conv_b
    cdt = jnp.dtype(compute_dtype)
    n, c, h, w = x_nchw.shape
    cpad = _round_up(c, _LANES)
    wpad = w + 2

    th = _pick_row_tile(h, w, cpad, cdt.itemsize, cdt.itemsize, _VMEM_BUDGET)
    ht = pl.cdiv(h, th)
    hp = ht * th

    # NCHW -> NHWC (channels on lanes).  Pad: 1 top halo row, bottom rows up
    # to hp plus 1 halo row, 1 halo col each side, channels to a lane multiple.
    # Total padded height = hp + 2 (vs. the old tile-sized zero pad).
    x_nhwc = jnp.transpose(x_nchw, (0, 2, 3, 1)).astype(cdt)
    x_pad = jnp.pad(x_nhwc, ((0, 0), (1, hp - h + 1), (1, 1), (0, cpad - c)))

    # Per-tap weights (9, Cin_pad, Cout_pad), tap-major = 3*dy + dx.
    w_taps = jnp.transpose(conv_w_oihw, (2, 3, 1, 0)).reshape(9, c, c)
    w_taps = jnp.pad(w_taps, ((0, 0), (0, cpad - c), (0, cpad - c))).astype(cdt)
    # TODO(synk): the weight block index is constant across the grid;
    # pipeline_mode=pl.Buffered(1) would drop its second VMEM buffer at very
    # large C (left off here to keep the lowering maximally portable).

    conv_out, stats = pl.pallas_call(
        functools.partial(_conv_stats_kernel, valid_h=h),
        out_shape=(jax.ShapeDtypeStruct((n, hp, w, cpad), cdt),
                   jax.ShapeDtypeStruct((n, ht, 2, cpad), jnp.float32)),
        grid=(n, ht),
        in_specs=[
            pl.BlockSpec((1, th, wpad, cpad), lambda b, i: (b, i, 0, 0)),
            pl.BlockSpec((1, 2, wpad, cpad),
                         lambda b, i: (b, (i + 1) * (th // 2), 0, 0)),
            pl.BlockSpec((9, cpad, cpad), lambda b, i: (0, 0, 0)),
        ],
        out_specs=(
            pl.BlockSpec((1, th, w, cpad), lambda b, i: (b, i, 0, 0)),
            pl.BlockSpec((1, 1, 2, cpad), lambda b, i: (b, i, 0, 0)),
        ),
        compiler_params=pltpu.CompilerParams(
            dimension_semantics=("parallel", "parallel"),
            vmem_limit_bytes=_VMEM_LIMIT),
    )(x_pad, x_pad, w_taps)

    # Finalize BN batch statistics (tiny O(C) XLA work) and fold scale/shift.
    count = jnp.float32(n * h * w)
    totals = jnp.sum(stats, axis=(0, 1))                    # (2, Cpad)
    mean = totals[0] / count
    var = jnp.maximum(totals[1] / count - mean * mean, 0.0)
    gamma = jnp.pad(bn_gamma.astype(jnp.float32), (0, cpad - c))
    beta = jnp.pad(bn_beta.astype(jnp.float32), (0, cpad - c))
    scale = gamma * lax.rsqrt(var + 1e-5)
    shift = beta - mean * scale

    # Phase 2: folded BN + ReLU; NHWC->NCHW transpose fused into the out spec.
    npix = hp * w
    p = _pick_pixel_tile(npix)
    cb = _LANES
    x2 = conv_out.reshape(n, npix, cpad)                    # free reshape
    s_row = scale.reshape(1, cpad)
    t_row = shift.reshape(1, cpad)

    y3 = pl.pallas_call(
        _bn_relu_nchw_kernel,
        out_shape=jax.ShapeDtypeStruct((n, cpad, npix), jnp.float32),
        grid=(n, cpad // cb, pl.cdiv(npix, p)),
        in_specs=[
            pl.BlockSpec((1, p, cb), lambda b, ci, pi: (b, pi, ci)),
            pl.BlockSpec((1, cb), lambda b, ci, pi: (0, ci)),
            pl.BlockSpec((1, cb), lambda b, ci, pi: (0, ci)),
        ],
        out_specs=pl.BlockSpec((1, cb, p), lambda b, ci, pi: (b, ci, pi)),
        compiler_params=pltpu.CompilerParams(
            dimension_semantics=("parallel", "parallel", "parallel"),
            vmem_limit_bytes=_VMEM_LIMIT),
    )(x2, s_row, t_row)

    # Drop channel / row padding (a no-op slice when C % 128 == 0 and th | H).
    return y3[:, :c, :h * w].reshape(n, c, h, w)


# ---------------------------------------------------------------------------
# Pure-JAX reference (conv + bias + train-mode BN + relu) for validation
# ---------------------------------------------------------------------------
def _reference(x_nchw, conv_w, conv_b, gamma, beta):
    y = lax.conv_general_dilated(
        x_nchw, conv_w, window_strides=(1, 1), padding="SAME",
        dimension_numbers=("NCHW", "OIHW", "NCHW"))
    y = y + conv_b[None, :, None, None]
    mean = jnp.mean(y, axis=(0, 2, 3), keepdims=True)
    var = jnp.mean((y - mean) ** 2, axis=(0, 2, 3), keepdims=True)
    y = (y - mean) * lax.rsqrt(var + 1e-5)
    y = y * gamma[None, :, None, None] + beta[None, :, None, None]
    return jnp.maximum(y, 0.0)


if __name__ == "__main__":
    # Small shapes consistent with the module (numChannel = 4).
    N, C, H, W = 2, 4, 16, 16
    key = jax.random.PRNGKey(0)
    kx, kw, kb = jax.random.split(key, 3)

    x = jax.random.normal(kx, (N, C, H, W), dtype=jnp.float32)
    # Parameter shapes/init conventions from nn.Conv2d / nn.BatchNorm2d:
    fan_in = C * 3 * 3
    bound = 1.0 / jnp.sqrt(fan_in)
    conv_w = jax.random.uniform(kw, (C, C, 3, 3), jnp.float32, -bound, bound)
    conv_b = jax.random.uniform(kb, (C,), jnp.float32, -bound, bound)
    bn_gamma = jnp.ones((C,), jnp.float32)
    bn_beta = jnp.zeros((C,), jnp.float32)

    ref = _reference(x, conv_w, conv_b, bn_gamma, bn_beta)

    # Exact-math check path (f32 MXU operands, f32 intermediate).
    out_f32 = jax.block_until_ready(
        resnet_forward(x, conv_w, conv_b, bn_gamma, bn_beta,
                       compute_dtype=jnp.float32))
    assert out_f32.shape == (N, C, H, W)
    assert jnp.allclose(out_f32, ref, atol=2e-4, rtol=2e-4), "f32 path mismatch"

    # Performance path (bf16 MXU operands + bf16 conv-out intermediate).
    out_bf16 = jax.block_until_ready(
        resnet_forward(x, conv_w, conv_b, bn_gamma, bn_beta))
    assert out_bf16.shape == (N, C, H, W)
    assert jnp.allclose(out_bf16, ref, atol=6e-2, rtol=6e-2), "bf16 path mismatch"

    print("KERNEL_OK")
</pallas_src>

<mosaic_0001>
module attributes {stable_mosaic.version = 11 : i64} {
  func.func @_bn_relu_nchw_kernel(%arg0: i32, %arg1: i32, %arg2: i32, %arg3: memref<1x256x128xf32, #tpu.memory_space<vmem>>, %arg4: memref<1x128xf32, #tpu.memory_space<vmem>>, %arg5: memref<1x128xf32, #tpu.memory_space<vmem>>, %arg6: memref<1x128x256xf32, #tpu.memory_space<vmem>>) attributes {dimension_semantics = [#tpu.dimension_semantics<parallel>, #tpu.dimension_semantics<parallel>, #tpu.dimension_semantics<parallel>], iteration_bounds = array<i64: 2, 1, 1>, scalar_prefetch = 0 : i64, scratch_operands = 0 : i64, tpu.core_type = #tpu.core_type<tc>, window_params = [{transform_indices = @transform_0, window_bounds = array<i64: 1, 256, 128>}, {transform_indices = @transform_1, window_bounds = array<i64: 1, 128>}, {transform_indices = @transform_2, window_bounds = array<i64: 1, 128>}, {transform_indices = @transform_3, window_bounds = array<i64: 1, 128, 256>}]} {
    %c0 = arith.constant 0 : index
    %c0_0 = arith.constant 0 : index
    %c0_1 = arith.constant 0 : index
    %0 = vector.load %arg3[%c0, %c0_0, %c0_1] : memref<1x256x128xf32, #tpu.memory_space<vmem>>, vector<1x256x128xf32>
    %1 = vector.shape_cast %0 : vector<1x256x128xf32> to vector<256x128xf32>
    %c0_2 = arith.constant 0 : index
    %c0_3 = arith.constant 0 : index
    %2 = vector.load %arg4[%c0_2, %c0_3] : memref<1x128xf32, #tpu.memory_space<vmem>>, vector<1x128xf32>
    %3 = vector.broadcast %2 : vector<1x128xf32> to vector<256x128xf32>
    %4 = arith.mulf %1, %3 : vector<256x128xf32>
    %c0_4 = arith.constant 0 : index
    %c0_5 = arith.constant 0 : index
    %5 = vector.load %arg5[%c0_4, %c0_5] : memref<1x128xf32, #tpu.memory_space<vmem>>, vector<1x128xf32>
    %6 = vector.broadcast %5 : vector<1x128xf32> to vector<256x128xf32>
    %7 = arith.addf %4, %6 : vector<256x128xf32>
    %cst = arith.constant 0.000000e+00 : f32
    %8 = vector.broadcast %cst : f32 to vector<256x128xf32>
    %9 = arith.maximumf %7, %8 : vector<256x128xf32>
    %10 = tpu.transpose %9, [1, 0] : vector<256x128xf32> -> vector<128x256xf32>
    %11 = vector.shape_cast %10 : vector<128x256xf32> to vector<1x128x256xf32>
    %c0_6 = arith.constant 0 : index
    %c0_7 = arith.constant 0 : index
    %c0_8 = arith.constant 0 : index
    %12 = vector.load %arg6[%c0_6, %c0_7, %c0_8] : memref<1x128x256xf32, #tpu.memory_space<vmem>>, vector<1x128x256xf32>
    tpu.vector_store %arg6[%c0_6, %c0_7, %c0_8], %11 {strides = array<i32>} : memref<1x128x256xf32, #tpu.memory_space<vmem>>, vector<1x128x256xf32>,
    return
  }
  func.func @transform_0(%arg0: i32, %arg1: i32, %arg2: i32) -> (i32, i32, i32) {
    %c0_i32 = arith.constant 0 : i32
    return %arg0, %arg2, %arg1 : i32, i32, i32
  }
  func.func @transform_1(%arg0: i32, %arg1: i32, %arg2: i32) -> (i32, i32) {
    %c0_i32 = arith.constant 0 : i32
    %c0_i32_0 = arith.constant 0 : i32
    return %c0_i32, %arg1 : i32, i32
  }
  func.func @transform_2(%arg0: i32, %arg1: i32, %arg2: i32) -> (i32, i32) {
    %c0_i32 = arith.constant 0 : i32
    %c0_i32_0 = arith.constant 0 : i32
    return %c0_i32, %arg1 : i32, i32
  }
  func.func @transform_3(%arg0: i32, %arg1: i32, %arg2: i32) -> (i32, i32, i32) {
    %c0_i32 = arith.constant 0 : i32
    return %arg0, %arg1, %arg2 : i32, i32, i32
  }
}

module attributes {stable_mosaic.version = 11 : i64} {
  func.func @_conv_stats_kernel(%arg0: i32, %arg1: i32, %arg2: memref<1x8x18x128xf32, #tpu.memory_space<vmem>>, %arg3: memref<1x2x18x128xf32, #tpu.memory_space<vmem>>, %arg4: memref<9x128x128xf32, #tpu.memory_space<vmem>>, %arg5: memref<1x8x16x128xf32, #tpu.memory_space<vmem>>, %arg6: memref<1x1x2x128xf32, #tpu.memory_space<vmem>>) attributes {dimension_semantics = [#tpu.dimension_semantics<parallel>, #tpu.dimension_semantics<parallel>], iteration_bounds = array<i64: 2, 2>, scalar_prefetch = 0 : i64, scratch_operands = 0 : i64, tpu.core_type = #tpu.core_type<tc>, window_params = [{transform_indices = @transform_0, window_bounds = array<i64: 1, 8, 18, 128>}, {transform_indices = @transform_1, window_bounds = array<i64: 1, 2, 18, 128>}, {pipeline_mode = #tpu.pipeline_mode<synchronous>, transform_indices = @transform_2, window_bounds = array<i64: 9, 128, 128>}, {transform_indices = @transform_3, window_bounds = array<i64: 1, 8, 16, 128>}, {transform_indices = @transform_4, window_bounds = array<i64: 1, 1, 2, 128>}]} {
    %c0 = arith.constant 0 : index
    %c0_0 = arith.constant 0 : index
    %c0_1 = arith.constant 0 : index
    %c0_2 = arith.constant 0 : index
    %0 = vector.load %arg2[%c0, %c0_0, %c0_1, %c0_2] : memref<1x8x18x128xf32, #tpu.memory_space<vmem>>, vector<1x8x18x128xf32>
    %1 = vector.shape_cast %0 : vector<1x8x18x128xf32> to vector<8x18x128xf32>
    %c0_3 = arith.constant 0 : index
    %c0_4 = arith.constant 0 : index
    %c0_5 = arith.constant 0 : index
    %c0_6 = arith.constant 0 : index
    %2 = vector.load %arg3[%c0_3, %c0_4, %c0_5, %c0_6] : memref<1x2x18x128xf32, #tpu.memory_space<vmem>>, vector<1x2x18x128xf32>
    %3 = vector.shape_cast %2 : vector<1x2x18x128xf32> to vector<2x18x128xf32>
    %4 = tpu.concatenate %1, %3 in 0 : vector<8x18x128xf32>, vector<2x18x128xf32> -> vector<10x18x128xf32>
    %cst = arith.constant 0.000000e+00 : f32
    %5 = vector.broadcast %cst : f32 to vector<128x128xf32>
    %6 = vector.extract_strided_slice %4 {offsets = [0, 0, 0], sizes = [8, 16, 128], strides = [1, 1, 1]} : vector<10x18x128xf32> to vector<8x16x128xf32>
    %7 = vector.shape_cast %6 : vector<8x16x128xf32> to vector<128x128xf32>
    %c0_7 = arith.constant 0 : index
    %c0_8 = arith.constant 0 : index
    %c0_9 = arith.constant 0 : index
    %8 = vector.load %arg4[%c0_7, %c0_8, %c0_9] : memref<9x128x128xf32, #tpu.memory_space<vmem>>, vector<1x128x128xf32>
    %9 = vector.shape_cast %8 : vector<1x128x128xf32> to vector<128x128xf32>
    %cst_10 = arith.constant dense<0.000000e+00> : vector<128x128xf32>
    %10 = tpu.matmul %7, %9, %cst_10 {dimension_numbers = #tpu.dot_dimension_numbers<[1], [0], [0], [1], [0, 0, 1, 1], [], []>} : vector<128x128xf32>, vector<128x128xf32>, vector<128x128xf32> -> vector<128x128xf32>
    %11 = arith.addf %5, %10 : vector<128x128xf32>
    %12 = vector.extract_strided_slice %4 {offsets = [0, 1, 0], sizes = [8, 16, 128], strides = [1, 1, 1]} : vector<10x18x128xf32> to vector<8x16x128xf32>
    %13 = vector.shape_cast %12 : vector<8x16x128xf32> to vector<128x128xf32>
    %c1 = arith.constant 1 : index
    %c0_11 = arith.constant 0 : index
    %c0_12 = arith.constant 0 : index
    %14 = vector.load %arg4[%c1, %c0_11, %c0_12] : memref<9x128x128xf32, #tpu.memory_space<vmem>>, vector<1x128x128xf32>
    %15 = vector.shape_cast %14 : vector<1x128x128xf32> to vector<128x128xf32>
    %cst_13 = arith.constant dense<0.000000e+00> : vector<128x128xf32>
    %16 = tpu.matmul %13, %15, %cst_13 {dimension_numbers = #tpu.dot_dimension_numbers<[1], [0], [0], [1], [0, 0, 1, 1], [], []>} : vector<128x128xf32>, vector<128x128xf32>, vector<128x128xf32> -> vector<128x128xf32>
    %17 = arith.addf %11, %16 : vector<128x128xf32>
    %18 = vector.extract_strided_slice %4 {offsets = [0, 2, 0], sizes = [8, 16, 128], strides = [1, 1, 1]} : vector<10x18x128xf32> to vector<8x16x128xf32>
    %19 = vector.shape_cast %18 : vector<8x16x128xf32> to vector<128x128xf32>
    %c2 = arith.constant 2 : index
    %c0_14 = arith.constant 0 : index
    %c0_15 = arith.constant 0 : index
    %20 = vector.load %arg4[%c2, %c0_14, %c0_15] : memref<9x128x128xf32, #tpu.memory_space<vmem>>, vector<1x128x128xf32>
    %21 = vector.shape_cast %20 : vector<1x128x128xf32> to vector<128x128xf32>
    %cst_16 = arith.constant dense<0.000000e+00> : vector<128x128xf32>
    %22 = tpu.matmul %19, %21, %cst_16 {dimension_numbers = #tpu.dot_dimension_numbers<[1], [0], [0], [1], [0, 0, 1, 1], [], []>} : vector<128x128xf32>, vector<128x128xf32>, vector<128x128xf32> -> vector<128x128xf32>
    %23 = arith.addf %17, %22 : vector<128x128xf32>
    %24 = vector.extract_strided_slice %4 {offsets = [1, 0, 0], sizes = [8, 16, 128], strides = [1, 1, 1]} : vector<10x18x128xf32> to vector<8x16x128xf32>
    %25 = vector.shape_cast %24 : vector<8x16x128xf32> to vector<128x128xf32>
    %c3 = arith.constant 3 : index
    %c0_17 = arith.constant 0 : index
    %c0_18 = arith.constant 0 : index
    %26 = vector.load %arg4[%c3, %c0_17, %c0_18] : memref<9x128x128xf32, #tpu.memory_space<vmem>>, vector<1x128x128xf32>
    %27 = vector.shape_cast %26 : vector<1x128x128xf32> to vector<128x128xf32>
    %cst_19 = arith.constant dense<0.000000e+00> : vector<128x128xf32>
    %28 = tpu.matmul %25, %27, %cst_19 {dimension_numbers = #tpu.dot_dimension_numbers<[1], [0], [0], [1], [0, 0, 1, 1], [], []>} : vector<128x128xf32>, vector<128x128xf32>, vector<128x128xf32> -> vector<128x128xf32>
    %29 = arith.addf %23, %28 : vector<128x128xf32>
    %30 = vector.extract_strided_slice %4 {offsets = [1, 1, 0], sizes = [8, 16, 128], strides = [1, 1, 1]} : vector<10x18x128xf32> to vector<8x16x128xf32>
    %31 = vector.shape_cast %30 : vector<8x16x128xf32> to vector<128x128xf32>
    %c4 = arith.constant 4 : index
    %c0_20 = arith.constant 0 : index
    %c0_21 = arith.constant 0 : index
    %32 = vector.load %arg4[%c4, %c0_20, %c0_21] : memref<9x128x128xf32, #tpu.memory_space<vmem>>, vector<1x128x128xf32>
    %33 = vector.shape_cast %32 : vector<1x128x128xf32> to vector<128x128xf32>
    %cst_22 = arith.constant dense<0.000000e+00> : vector<128x128xf32>
    %34 = tpu.matmul %31, %33, %cst_22 {dimension_numbers = #tpu.dot_dimension_numbers<[1], [0], [0], [1], [0, 0, 1, 1], [], []>} : vector<128x128xf32>, vector<128x128xf32>, vector<128x128xf32> -> vector<128x128xf32>
    %35 = arith.addf %29, %34 : vector<128x128xf32>
    %36 = vector.extract_strided_slice %4 {offsets = [1, 2, 0], sizes = [8, 16, 128], strides = [1, 1, 1]} : vector<10x18x128xf32> to vector<8x16x128xf32>
    %37 = vector.shape_cast %36 : vector<8x16x128xf32> to vector<128x128xf32>
    %c5 = arith.constant 5 : index
    %c0_23 = arith.constant 0 : index
    %c0_24 = arith.constant 0 : index
    %38 = vector.load %arg4[%c5, %c0_23, %c0_24] : memref<9x128x128xf32, #tpu.memory_space<vmem>>, vector<1x128x128xf32>
    %39 = vector.shape_cast %38 : vector<1x128x128xf32> to vector<128x128xf32>
    %cst_25 = arith.constant dense<0.000000e+00> : vector<128x128xf32>
    %40 = tpu.matmul %37, %39, %cst_25 {dimension_numbers = #tpu.dot_dimension_numbers<[1], [0], [0], [1], [0, 0, 1, 1], [], []>} : vector<128x128xf32>, vector<128x128xf32>, vector<128x128xf32> -> vector<128x128xf32>
    %41 = arith.addf %35, %40 : vector<128x128xf32>
    %42 = vector.extract_strided_slice %4 {offsets = [2, 0, 0], sizes = [8, 16, 128], strides = [1, 1, 1]} : vector<10x18x128xf32> to vector<8x16x128xf32>
    %43 = vector.shape_cast %42 : vector<8x16x128xf32> to vector<128x128xf32>
    %c6 = arith.constant 6 : index
    %c0_26 = arith.constant 0 : index
    %c0_27 = arith.constant 0 : index
    %44 = vector.load %arg4[%c6, %c0_26, %c0_27] : memref<9x128x128xf32, #tpu.memory_space<vmem>>, vector<1x128x128xf32>
    %45 = vector.shape_cast %44 : vector<1x128x128xf32> to vector<128x128xf32>
    %cst_28 = arith.constant dense<0.000000e+00> : vector<128x128xf32>
    %46 = tpu.matmul %43, %45, %cst_28 {dimension_numbers = #tpu.dot_dimension_numbers<[1], [0], [0], [1], [0, 0, 1, 1], [], []>} : vector<128x128xf32>, vector<128x128xf32>, vector<128x128xf32> -> vector<128x128xf32>
    %47 = arith.addf %41, %46 : vector<128x128xf32>
    %48 = vector.extract_strided_slice %4 {offsets = [2, 1, 0], sizes = [8, 16, 128], strides = [1, 1, 1]} : vector<10x18x128xf32> to vector<8x16x128xf32>
    %49 = vector.shape_cast %48 : vector<8x16x128xf32> to vector<128x128xf32>
    %c7 = arith.constant 7 : index
    %c0_29 = arith.constant 0 : index
    %c0_30 = arith.constant 0 : index
    %50 = vector.load %arg4[%c7, %c0_29, %c0_30] : memref<9x128x128xf32, #tpu.memory_space<vmem>>, vector<1x128x128xf32>
    %51 = vector.shape_cast %50 : vector<1x128x128xf32> to vector<128x128xf32>
    %cst_31 = arith.constant dense<0.000000e+00> : vector<128x128xf32>
    %52 = tpu.matmul %49, %51, %cst_31 {dimension_numbers = #tpu.dot_dimension_numbers<[1], [0], [0], [1], [0, 0, 1, 1], [], []>} : vector<128x128xf32>, vector<128x128xf32>, vector<128x128xf32> -> vector<128x128xf32>
    %53 = arith.addf %47, %52 : vector<128x128xf32>
    %54 = vector.extract_strided_slice %4 {offsets = [2, 2, 0], sizes = [8, 16, 128], strides = [1, 1, 1]} : vector<10x18x128xf32> to vector<8x16x128xf32>
    %55 = vector.shape_cast %54 : vector<8x16x128xf32> to vector<128x128xf32>
    %c8 = arith.constant 8 : index
    %c0_32 = arith.constant 0 : index
    %c0_33 = arith.constant 0 : index
    %56 = vector.load %arg4[%c8, %c0_32, %c0_33] : memref<9x128x128xf32, #tpu.memory_space<vmem>>, vector<1x128x128xf32>
    %57 = vector.shape_cast %56 : vector<1x128x128xf32> to vector<128x128xf32>
    %cst_34 = arith.constant dense<0.000000e+00> : vector<128x128xf32>
    %58 = tpu.matmul %55, %57, %cst_34 {dimension_numbers = #tpu.dot_dimension_numbers<[1], [0], [0], [1], [0, 0, 1, 1], [], []>} : vector<128x128xf32>, vector<128x128xf32>, vector<128x128xf32> -> vector<128x128xf32>
    %59 = arith.addf %53, %58 : vector<128x128xf32>
    %60 = vector.shape_cast %59 : vector<128x128xf32> to vector<1x8x16x128xf32>
    %c0_35 = arith.constant 0 : index
    %c0_36 = arith.constant 0 : index
    %c0_37 = arith.constant 0 : index
    %c0_38 = arith.constant 0 : index
    %61 = vector.load %arg5[%c0_35, %c0_36, %c0_37, %c0_38] : memref<1x8x16x128xf32, #tpu.memory_space<vmem>>, vector<1x8x16x128xf32>
    tpu.vector_store %arg5[%c0_35, %c0_36, %c0_37, %c0_38], %60 {strides = array<i32>} : memref<1x8x16x128xf32, #tpu.memory_space<vmem>>, vector<1x8x16x128xf32>,
    %62 = tpu.iota {dimensions = array<i32: 0>} : vector<8x16x1xi32>
    %63 = vector.shape_cast %62 : vector<8x16x1xi32> to vector<128x1xi32>
    %c8_i32 = arith.constant 8 : i32
    %64 = arith.muli %arg1, %c8_i32 : i32
    %65 = vector.broadcast %64 : i32 to vector<128x1xi32>
    %66 = arith.addi %63, %65 : vector<128x1xi32>
    %c16_i32 = arith.constant 16 : i32
    %67 = vector.broadcast %c16_i32 : i32 to vector<128x1xi32>
    %68 = arith.cmpi slt, %66, %67 : vector<128x1xi32>
    %cst_39 = arith.constant 0.000000e+00 : f32
    %69 = vector.shape_cast %68 : vector<128x1xi1> to vector<128x1xi1>
    %70 = vector.broadcast %69 : vector<128x1xi1> to vector<128x128xi1>
    %71 = vector.broadcast %cst_39 : f32 to vector<128x128xf32>
    %72 = arith.select %70, %59, %71 : vector<128x128xi1>, vector<128x128xf32>
    %cst_40 = arith.constant dense<0.000000e+00> : vector<128xf32>
    %73 = vector.multi_reduction <add>, %72, %cst_40 [0] : vector<128x128xf32> to vector<128xf32>
    %74 = vector.shape_cast %73 : vector<128xf32> to vector<1x128xf32>
    %75 = arith.mulf %72, %59 : vector<128x128xf32>
    %cst_41 = arith.constant dense<0.000000e+00> : vector<128xf32>
    %76 = vector.multi_reduction <add>, %75, %cst_41 [0] : vector<128x128xf32> to vector<128xf32>
    %77 = vector.shape_cast %76 : vector<128xf32> to vector<1x128xf32>
    %78 = tpu.concatenate %74, %77 in 0 : vector<1x128xf32>, vector<1x128xf32> -> vector<2x128xf32>
    %79 = vector.shape_cast %78 : vector<2x128xf32> to vector<1x1x2x128xf32>
    %c0_42 = arith.constant 0 : index
    %c0_43 = arith.constant 0 : index
    %c0_44 = arith.constant 0 : index
    %c0_45 = arith.constant 0 : index
    %80 = vector.load %arg6[%c0_42, %c0_43, %c0_44, %c0_45] : memref<1x1x2x128xf32, #tpu.memory_space<vmem>>, vector<1x1x2x128xf32>
    tpu.vector_store %arg6[%c0_42, %c0_43, %c0_44, %c0_45], %79 {strides = array<i32>} : memref<1x1x2x128xf32, #tpu.memory_space<vmem>>, vector<1x1x2x128xf32>,
    return
  }
  func.func @transform_0(%arg0: i32, %arg1: i32) -> (i32, i32, i32, i32) {
    %c0_i32 = arith.constant 0 : i32
    %c0_i32_0 = arith.constant 0 : i32
    %c0_i32_1 = arith.constant 0 : i32
    return %arg0, %arg1, %c0_i32, %c0_i32_0 : i32, i32, i32, i32
  }
  func.func @transform_1(%arg0: i32, %arg1: i32) -> (i32, i32, i32, i32) {
    %c1_i32 = arith.constant 1 : i32
    %0 = arith.addi %arg1, %c1_i32 : i32
    %c4_i32 = arith.constant 4 : i32
    %1 = arith.muli %0, %c4_i32 : i32
    %c0_i32 = arith.constant 0 : i32
    %c0_i32_0 = arith.constant 0 : i32
    %c0_i32_1 = arith.constant 0 : i32
    return %arg0, %1, %c0_i32, %c0_i32_0 : i32, i32, i32, i32
  }
  func.func @transform_2(%arg0: i32, %arg1: i32) -> (i32, i32, i32) {
    %c0_i32 = arith.constant 0 : i32
    %c0_i32_0 = arith.constant 0 : i32
    %c0_i32_1 = arith.constant 0 : i32
    %c0_i32_2 = arith.constant 0 : i32
    return %c0_i32, %c0_i32_0, %c0_i32_1 : i32, i32, i32
  }
  func.func @transform_3(%arg0: i32, %arg1: i32) -> (i32, i32, i32, i32) {
    %c0_i32 = arith.constant 0 : i32
    %c0_i32_0 = arith.constant 0 : i32
    %c0_i32_1 = arith.constant 0 : i32
    return %arg0, %arg1, %c0_i32, %c0_i32_0 : i32, i32, i32, i32
  }
  func.func @transform_4(%arg0: i32, %arg1: i32) -> (i32, i32, i32, i32) {
    %c0_i32 = arith.constant 0 : i32
    %c0_i32_0 = arith.constant 0 : i32
    %c0_i32_1 = arith.constant 0 : i32
    return %arg0, %arg1, %c0_i32, %c0_i32_0 : i32, i32, i32, i32
  }
}

</mosaic_0001>

<bundles_post_ra>
// kernel: resnet_forward.3
= control target key start
LH: loop header
LB: loop body
LE: loop exit
PB: predicated region body
PF: predicated region fallthrough
CT: control target
= control target key end

     0   :  { %s728_s12 = smov 0   ;;  %s730_s13 = smov 0   ;;  %s910_s0 = inlined_call_operand.vmem [shape: f32[2,256,128], index: 0, kind: input, shape index: {}]   ;;  %s911_s1 = inlined_call_operand.vmem [shape: f32[1,128], index: 1, kind: input, shape index: {}]   ;;  %s912_s2 = inlined_call_operand.vmem [shape: f32[1,128], index: 2, kind: input, shape index: {}]   ;;  %s913_s3 = inlined_call_operand.vmem [shape: f32[2,128,256], index: 3, kind: output, shape index: {}]  }
   0x1   :  { %s732_s14 = smov 0  }
   0x2 LB: > { %s32_s15 = sadd.s32 1, %s702_s13  ;;  %p649_p0 = scmp.ge.s32.totalorder %s706_s14, 1  ;;  %s706_s14 = sphi %s732_s14, %s13_s14   ;;  %s702_s13 = sphi %s730_s13, %s915_s13   ;;  %s698_s12 = sphi %s728_s12, %s914_s12  }
   0x3   : > { %p34_p1 = scmp.ge.s32.totalorder %s32_s15, 2  ;;  %p188_p2 = scmp.lt.s32.totalorder %s706_s14, 3 }
   0x5   : > { %s917_s15 = smov (%p34_p1, %s32_s15), 0  ;;  %p189_p3 = pnand %p649_p0, %p188_p2 }
   0x6   : > { %p235_p4 = scmp.lt.s32.totalorder (!%p189_p3), %s698_s12, 1  ;;  %v752_v0 = vld [vmem:[%s911_s1] ss:$0 sm:$0xff] (!%p189_p3) }
   0x7   : > { %192 = sbr.rel (%p189_p3) target bundleno = 215 (0xd7), region = 32  ;;  %v764_v1 = vld [vmem:[%s912_s2] ss:$0 sm:$0xff] (!%p189_p3) }
   0xe   : > { %s919_s12 = smov (!%p235_p4, %s698_s12), 1 }
   0xf   : > { %s658_s16 = sshll.u32 %s919_s12, 8 }
  0x10   : > { %s759_s21 = scalar_lea.vmem %s910_s0, %s658_s16  ;;  %s867_s26 = scalar_lea.vmem %s913_s3, %s658_s16 }
  0x11   : > { %v285_v2 = vld [vmem:[%s759_s21 + $0x80] sm:$0xff]  ;;  %v286_v4 = vld [vmem:[%s759_s21 + $0x88] sm:$0xff]  ;;  %v287_v9 = vld [vmem:[%s759_s21 + $0x90] sm:$0xff] }
  0x12   : > { %v269_v3 = vld [vmem:[%s759_s21] sm:$0xff]  ;;  %v324_v5 = vmul.f32 %v752_v0, %v285_v2  ;;  %v325_v7 = vmul.f32 %v752_v0, %v286_v4  ;;  %v270_v8 = vld [vmem:[%s759_s21 + $0x8] sm:$0xff]  ;;  %v271_v10 = vld [vmem:[%s759_s21 + $0x10] sm:$0xff]  ;;  %v326_v12 = vmul.f32 %v752_v0, %v287_v9 }
  0x13   : > { %v308_v6 = vmul.f32 %v752_v0, %v269_v3  ;;  %v309_v11 = vmul.f32 %v752_v0, %v270_v8  ;;  %v310_v16 = vmul.f32 %v752_v0, %v271_v10  ;;  %v288_v17 = vld [vmem:[%s759_s21 + $0x98] sm:$0xff]  ;;  %v289_v28 = vld [vmem:[%s759_s21 + $0xa0] sm:$0xff]  ;;  %v290_v36 = vld [vmem:[%s759_s21 + $0xa8] sm:$0xff] }
  0x14   : > { %v363_v13 = vadd.f32 %v764_v1, %v324_v5  ;;  %v364_v15 = vadd.f32 %v764_v1, %v325_v7  ;;  %v272_v19 = vld [vmem:[%s759_s21 + $0x18] sm:$0xff]  ;;  %v365_v22 = vadd.f32 %v764_v1, %v326_v12  ;;  %v327_v23 = vmul.f32 %v752_v0, %v288_v17  ;;  %v273_v29 = vld [vmem:[%s759_s21 + $0x20] sm:$0xff]  ;;  %v274_v37 = vld [vmem:[%s759_s21 + $0x28] sm:$0xff] }
  0x15   : > { %v347_v14 = vadd.f32 %v764_v1, %v308_v6  ;;  %v348_v18 = vadd.f32 %v764_v1, %v309_v11  ;;  %v349_v26 = vadd.f32 %v764_v1, %v310_v16  ;;  %v311_v27 = vmul.f32 %v752_v0, %v272_v19  ;;  %v291_v44 = vld [vmem:[%s759_s21 + $0xb0] sm:$0xff]  ;;  %v292_v52 = vld [vmem:[%s759_s21 + $0xb8] sm:$0xff]  ;;  %v293_v60 = vld [vmem:[%s759_s21 + $0xc0] sm:$0xff] }
  0x16   : > { %v395_v20 = vmax.f32 %v363_v13, 0.0  ;;  %v396_v24 = vmax.f32 %v364_v15, 0.0  ;;  %v397_v30 = vmax.f32 %v365_v22, 0.0  ;;  %v366_v31 = vadd.f32 %v764_v1, %v327_v23  ;;  %v275_v45 = vld [vmem:[%s759_s21 + $0x30] sm:$0xff]  ;;  %v276_v53 = vld [vmem:[%s759_s21 + $0x38] sm:$0xff]  ;;  %v277_v61 = vld [vmem:[%s759_s21 + $0x40] sm:$0xff] }
  0x17   : > { %v379_v21 = vmax.f32 %v347_v14, 0.0  ;;  %v380_v25 = vmax.f32 %v348_v18, 0.0  ;;  %v381_v32 = vmax.f32 %v349_v26, 0.0  ;;  %v350_v33 = vadd.f32 %v764_v1, %v311_v27  ;;  %v294_v6 = vld [vmem:[%s759_s21 + $0xc8] sm:$0xff]  ;;  %v295_v14 = vld [vmem:[%s759_s21 + $0xd0] sm:$0xff]  ;;  %v296_v22 = vld [vmem:[%s759_s21 + $0xd8] sm:$0xff] }
  0x18   : > { %443 = vxpose.xlu1.b32.start [1/16] %v395_v20, 128  ;;  %v328_v34 = vmul.f32 %v752_v0, %v289_v28  ;;  %v312_v35 = vmul.f32 %v752_v0, %v273_v29  ;;  %v398_v38 = vmax.f32 %v366_v31, 0.0  ;;  %v329_v39 = vmul.f32 %v752_v0, %v290_v36  ;;  %v278_v7 = vld [vmem:[%s759_s21 + $0x48] sm:$0xff]  ;;  %v279_v15 = vld [vmem:[%s759_s21 + $0x50] sm:$0xff]  ;;  %v280_v23 = vld [vmem:[%s759_s21 + $0x58] sm:$0xff] }
  0x19   : > { %411 = vxpose.xlu0.b32.start [1/16] %v379_v21, 128  ;;  %v382_v40 = vmax.f32 %v350_v33, 0.0  ;;  %v313_v43 = vmul.f32 %v752_v0, %v274_v37  ;;  %v330_v46 = vmul.f32 %v752_v0, %v291_v44  ;;  %v314_v47 = vmul.f32 %v752_v0, %v275_v45  ;;  %v281_v31 = vld [vmem:[%s759_s21 + $0x60] sm:$0xff] }
  0x1a   : > { %v367_v41 = vadd.f32 %v764_v1, %v328_v34  ;;  %v351_v42 = vadd.f32 %v764_v1, %v312_v35  ;;  %v368_v50 = vadd.f32 %v764_v1, %v329_v39  ;;  %v331_v55 = vmul.f32 %v752_v0, %v292_v52  ;;  %v282_v39 = vld [vmem:[%s759_s21 + $0x68] sm:$0xff] }
  0x1b   : > { %v352_v51 = vadd.f32 %v764_v1, %v313_v43  ;;  %v369_v54 = vadd.f32 %v764_v1, %v330_v46  ;;  %v353_v58 = vadd.f32 %v764_v1, %v314_v47  ;;  %v315_v59 = vmul.f32 %v752_v0, %v276_v53  ;;  %v299_v46 = vld [vmem:[%s759_s21 + $0xf0] sm:$0xff] }
  0x1c   : > { %444 = vxpose.xlu1.b32.cont [2/16] %v396_v24, 128  ;;  %v399_v48 = vmax.f32 %v367_v41, 0.0  ;;  %v383_v49 = vmax.f32 %v351_v42, 0.0  ;;  %v400_v56 = vmax.f32 %v368_v50, 0.0  ;;  %v370_v63 = vadd.f32 %v764_v1, %v331_v55  ;;  %v283_v47 = vld [vmem:[%s759_s21 + $0x70] sm:$0xff]  ;;  %v284_v55 = vld [vmem:[%s759_s21 + $0x78] sm:$0xff] }
  0x1d   : > { %412 = vxpose.xlu0.b32.cont [2/16] %v380_v25, 128  ;;  %v384_v57 = vmax.f32 %v352_v51, 0.0  ;;  %v401_v62 = vmax.f32 %v369_v54, 0.0  ;;  %v385_v2 = vmax.f32 %v353_v58, 0.0  ;;  %v354_v3 = vadd.f32 %v764_v1, %v315_v59  ;;  %v300_v54 = vld [vmem:[%s759_s21 + $0xf8] sm:$0xff] }
  0x1e   : > { %v332_v4 = vmul.f32 %v752_v0, %v293_v60  ;;  %v316_v5 = vmul.f32 %v752_v0, %v277_v61  ;;  %v402_v8 = vmax.f32 %v370_v63, 0.0  ;;  %v333_v9 = vmul.f32 %v752_v0, %v294_v6 }
  0x1f   : > { %v386_v10 = vmax.f32 %v354_v3, 0.0  ;;  %v317_v13 = vmul.f32 %v752_v0, %v278_v7  ;;  %v334_v16 = vmul.f32 %v752_v0, %v295_v14  ;;  %v318_v17 = vmul.f32 %v752_v0, %v279_v15 }
  0x20   : > { %445 = vxpose.xlu1.b32.cont [3/16] %v397_v30, 128  ;;  %v371_v11 = vadd.f32 %v764_v1, %v332_v4  ;;  %v355_v12 = vadd.f32 %v764_v1, %v316_v5  ;;  %v372_v20 = vadd.f32 %v764_v1, %v333_v9  ;;  %v335_v25 = vmul.f32 %v752_v0, %v296_v22  ;;  %v297_v30 = vld [vmem:[%s759_s21 + $0xe0] sm:$0xff] }
  0x21   : > { %413 = vxpose.xlu0.b32.cont [3/16] %v381_v32, 128  ;;  %v356_v21 = vadd.f32 %v764_v1, %v317_v13  ;;  %v373_v24 = vadd.f32 %v764_v1, %v334_v16  ;;  %v357_v28 = vadd.f32 %v764_v1, %v318_v17  ;;  %v319_v29 = vmul.f32 %v752_v0, %v280_v23 }
  0x22   : > { %v403_v18 = vmax.f32 %v371_v11, 0.0  ;;  %v387_v19 = vmax.f32 %v355_v12, 0.0  ;;  %v404_v26 = vmax.f32 %v372_v20, 0.0  ;;  %v374_v33 = vadd.f32 %v764_v1, %v335_v25 }
  0x23   : > { %v388_v27 = vmax.f32 %v356_v21, 0.0  ;;  %v405_v32 = vmax.f32 %v373_v24, 0.0  ;;  %v389_v34 = vmax.f32 %v357_v28, 0.0  ;;  %v358_v35 = vadd.f32 %v764_v1, %v319_v29 }
  0x24   : > { %446 = vxpose.xlu1.b32.cont [4/16] %v398_v38, 128  ;;  %v336_v36 = vmul.f32 %v752_v0, %v297_v30  ;;  %v320_v37 = vmul.f32 %v752_v0, %v281_v31  ;;  %v298_v38 = vld [vmem:[%s759_s21 + $0xe8] sm:$0xff]  ;;  %v321_v45 = vmul.f32 %v752_v0, %v282_v39  ;;  %v323_v61 = vmul.f32 %v752_v0, %v284_v55 }
  0x25   : > { %414 = vxpose.xlu0.b32.cont [4/16] %v382_v40, 128  ;;  %v406_v40 = vmax.f32 %v374_v33, 0.0  ;;  %v337_v41 = vmul.f32 %v752_v0, %v298_v38  ;;  %v390_v42 = vmax.f32 %v358_v35, 0.0 }
  0x26   : > { %v375_v43 = vadd.f32 %v764_v1, %v336_v36  ;;  %v359_v44 = vadd.f32 %v764_v1, %v320_v37  ;;  %v360_v53 = vadd.f32 %v764_v1, %v321_v45  ;;  %v362_v3 = vadd.f32 %v764_v1, %v323_v61 }
  0x27   : > { %v376_v52 = vadd.f32 %v764_v1, %v337_v41 }
  0x28   : > { %447 = vxpose.xlu1.b32.cont [5/16] %v399_v48, 128  ;;  %v338_v48 = vmul.f32 %v752_v0, %v299_v46  ;;  %v407_v50 = vmax.f32 %v375_v43, 0.0  ;;  %v391_v51 = vmax.f32 %v359_v44, 0.0  ;;  %v392_v59 = vmax.f32 %v360_v53, 0.0 }
  0x29   : > { %415 = vxpose.xlu0.b32.cont [5/16] %v383_v49, 128  ;;  %v322_v49 = vmul.f32 %v752_v0, %v283_v47  ;;  %v408_v58 = vmax.f32 %v376_v52, 0.0  ;;  %v394_v5 = vmax.f32 %v362_v3, 0.0 }
  0x2b   : > { %v361_v60 = vadd.f32 %v764_v1, %v322_v49 }
  0x2c   : > { %448 = vxpose.xlu1.b32.cont [6/16] %v400_v56, 128  ;;  %v377_v56 = vadd.f32 %v764_v1, %v338_v48 }
  0x2d   : > { %416 = vxpose.xlu0.b32.cont [6/16] %v384_v57, 128  ;;  %v339_v57 = vmul.f32 %v752_v0, %v300_v54  ;;  %v393_v63 = vmax.f32 %v361_v60, 0.0 }
  0x30   : > { %449 = vxpose.xlu1.b32.cont [7/16] %v401_v62, 128  ;;  %v409_v62 = vmax.f32 %v377_v56, 0.0 }
  0x31   : > { %417 = vxpose.xlu0.b32.cont [7/16] %v385_v2, 128  ;;  %v378_v2 = vadd.f32 %v764_v1, %v339_v57 }
  0x33   : > { %v410_v4 = vmax.f32 %v378_v2, 0.0 }
  0x34   : > { %450 = vxpose.xlu1.b32.cont [8/16] %v402_v8, 128 }
  0x35   : > { %418 = vxpose.xlu0.b32.cont [8/16] %v386_v10, 128 }
  0x38   : > { %451 = vxpose.xlu1.b32.cont [9/16] %v403_v18, 128 }
  0x39   : > { %419 = vxpose.xlu0.b32.cont [9/16] %v387_v19, 128 }
  0x3c   : > { %452 = vxpose.xlu1.b32.cont [10/16] %v404_v26, 128 }
  0x3d   : > { %420 = vxpose.xlu0.b32.cont [10/16] %v388_v27, 128 }
  0x40   : > { %453 = vxpose.xlu1.b32.cont [11/16] %v405_v32, 128 }
  0x41   : > { %421 = vxpose.xlu0.b32.cont [11/16] %v389_v34, 128 }
  0x44   : > { %454 = vxpose.xlu1.b32.cont [12/16] %v406_v40, 128 }
  0x45   : > { %422 = vxpose.xlu0.b32.cont [12/16] %v390_v42, 128 }
  0x48   : > { %455 = vxpose.xlu1.b32.cont [13/16] %v407_v50, 128 }
  0x49   : > { %423 = vxpose.xlu0.b32.cont [13/16] %v391_v51, 128 }
  0x4c   : > { %456 = vxpose.xlu1.b32.cont [14/16] %v408_v58, 128 }
  0x4d   : > { %424 = vxpose.xlu0.b32.cont [14/16] %v392_v59, 128 }
  0x50   : > { %457 = vxpose.xlu1.b32.cont [15/16] %v409_v62, 128 }
  0x51   : > { %425 = vxpose.xlu0.b32.cont [15/16] %v393_v63, 128 }
  0x54   : > { %458 = vxpose.xlu1.b32.end [16/16] %v410_v4, 128 }
  0x55   : > { %426 = vxpose.xlu0.b32.end [16/16] %v394_v5, 128 }
  0x98   : > { %v459_v0 = vpop.trf.xlu1 }
  0x99   : > { %v427_v1 = vpop.trf.xlu0  ;;  %476 = vst [vmem:[%s867_s26 + $0x8] sm:$0xff] %v459_v0 }
  0x9a   : > { %475 = vst [vmem:[%s867_s26] sm:$0xff] %v427_v1 }
  0x9c   : > { %v460_v6 = vpop.trf.xlu1 }
  0x9d   : > { %v428_v7 = vpop.trf.xlu0  ;;  %478 = vst [vmem:[%s867_s26 + $0x18] sm:$0xff] %v460_v6 }
  0x9e   : > { %477 = vst [vmem:[%s867_s26 + $0x10] sm:$0xff] %v428_v7 }
  0xa0   : > { %v461_v8 = vpop.trf.xlu1 }
  0xa1   : > { %v429_v9 = vpop.trf.xlu0  ;;  %480 = vst [vmem:[%s867_s26 + $0x28] sm:$0xff] %v461_v8 }
  0xa2   : > { %479 = vst [vmem:[%s867_s26 + $0x20] sm:$0xff] %v429_v9 }
  0xa4   : > { %v462_v10 = vpop.trf.xlu1 }
  0xa5   : > { %v430_v11 = vpop.trf.xlu0  ;;  %482 = vst [vmem:[%s867_s26 + $0x38] sm:$0xff] %v462_v10 }
  0xa6   : > { %481 = vst [vmem:[%s867_s26 + $0x30] sm:$0xff] %v430_v11 }
  0xa8   : > { %v463_v12 = vpop.trf.xlu1 }
  0xa9   : > { %v431_v13 = vpop.trf.xlu0  ;;  %484 = vst [vmem:[%s867_s26 + $0x48] sm:$0xff] %v463_v12 }
  0xaa   : > { %483 = vst [vmem:[%s867_s26 + $0x40] sm:$0xff] %v431_v13 }
  0xac   : > { %v464_v14 = vpop.trf.xlu1 }
  0xad   : > { %v432_v15 = vpop.trf.xlu0  ;;  %486 = vst [vmem:[%s867_s26 + $0x58] sm:$0xff] %v464_v14 }
  0xae   : > { %485 = vst [vmem:[%s867_s26 + $0x50] sm:$0xff] %v432_v15 }
  0xb0   : > { %v465_v16 = vpop.trf.xlu1 }
  0xb1   : > { %v433_v17 = vpop.trf.xlu0  ;;  %488 = vst [vmem:[%s867_s26 + $0x68] sm:$0xff] %v465_v16 }
  0xb2   : > { %487 = vst [vmem:[%s867_s26 + $0x60] sm:$0xff] %v433_v17 }
  0xb4   : > { %v466_v18 = vpop.trf.xlu1 }
  0xb5   : > { %v434_v19 = vpop.trf.xlu0  ;;  %490 = vst [vmem:[%s867_s26 + $0x78] sm:$0xff] %v466_v18 }
  0xb6   : > { %489 = vst [vmem:[%s867_s26 + $0x70] sm:$0xff] %v434_v19 }
  0xb8   : > { %v467_v20 = vpop.trf.xlu1 }
  0xb9   : > { %v435_v21 = vpop.trf.xlu0  ;;  %492 = vst [vmem:[%s867_s26 + $0x88] sm:$0xff] %v467_v20 }
  0xba   : > { %491 = vst [vmem:[%s867_s26 + $0x80] sm:$0xff] %v435_v21 }
  0xbc   : > { %v468_v22 = vpop.trf.xlu1 }
  0xbd   : > { %v436_v23 = vpop.trf.xlu0  ;;  %494 = vst [vmem:[%s867_s26 + $0x98] sm:$0xff] %v468_v22 }
  0xbe   : > { %493 = vst [vmem:[%s867_s26 + $0x90] sm:$0xff] %v436_v23 }
  0xc0   : > { %v469_v24 = vpop.trf.xlu1 }
  0xc1   : > { %v437_v25 = vpop.trf.xlu0  ;;  %496 = vst [vmem:[%s867_s26 + $0xa8] sm:$0xff] %v469_v24 }
  0xc2   : > { %495 = vst [vmem:[%s867_s26 + $0xa0] sm:$0xff] %v437_v25 }
  0xc4   : > { %v470_v26 = vpop.trf.xlu1 }
  0xc5   : > { %v438_v27 = vpop.trf.xlu0  ;;  %498 = vst [vmem:[%s867_s26 + $0xb8] sm:$0xff] %v470_v26 }
  0xc6   : > { %497 = vst [vmem:[%s867_s26 + $0xb0] sm:$0xff] %v438_v27 }
  0xc8   : > { %v471_v28 = vpop.trf.xlu1 }
  0xc9   : > { %v439_v29 = vpop.trf.xlu0  ;;  %500 = vst [vmem:[%s867_s26 + $0xc8] sm:$0xff] %v471_v28 }
  0xca   : > { %499 = vst [vmem:[%s867_s26 + $0xc0] sm:$0xff] %v439_v29 }
  0xcc   : > { %v472_v30 = vpop.trf.xlu1 }
  0xcd   : > { %v440_v31 = vpop.trf.xlu0  ;;  %502 = vst [vmem:[%s867_s26 + $0xd8] sm:$0xff] %v472_v30 }
  0xce   : > { %501 = vst [vmem:[%s867_s26 + $0xd0] sm:$0xff] %v440_v31 }
  0xd0   : > { %v473_v32 = vpop.trf.xlu1 }
  0xd1   : > { %v441_v33 = vpop.trf.xlu0  ;;  %504 = vst [vmem:[%s867_s26 + $0xe8] sm:$0xff] %v473_v32 }
  0xd2   : > { %503 = vst [vmem:[%s867_s26 + $0xe0] sm:$0xff] %v441_v33 }
  0xd4   : > { %v474_v34 = vpop.trf.xlu1 }
  0xd5   : > { %v442_v35 = vpop.trf.xlu0  ;;  %506 = vst [vmem:[%s867_s26 + $0xf8] sm:$0xff] %v474_v34 }
  0xd6   : > { %505 = vst [vmem:[%s867_s26 + $0xf0] sm:$0xff] %v442_v35 }
  0xd7 PF: > { %s13_s14 = sadd.s32 1, %s706_s14   ;;  %s914_s12 = smov %s702_s13 }
  0xd8   : > { %p10_p5 = scmp.ge.s32.totalorder %s13_s14, 4   ;;  %s915_s13 = smov %s917_s15 }
  0xda   :  { %12 = sbr.rel (!%p10_p5) target bundleno = 2 (0x2), region = 68 }

// kernel: resnet_forward.2
= control target key start
LH: loop header
LB: loop body
LE: loop exit
PB: predicated region body
PF: predicated region fallthrough
CT: control target
= control target key end

     0   :  { %s3897_s15 = smov 0   ;;  %s3899_s16 = smov 0   ;;  %s4932_s0 = inlined_call_operand.vmem [shape: f32[2,18,18,128], index: 0, kind: input, shape index: {}, may-alias: {0,1}]   ;;  %s4933_s1 = inlined_call_operand.vmem [shape: f32[2,18,18,128], index: 1, kind: input, shape index: {}, may-alias: {0,1}]   ;;  %s4934_s2 = inlined_call_operand.vmem [shape: f32[9,128,128], index: 2, kind: input, shape index: {}]   ;;  %s4935_s3 = inlined_call_operand.vmem [shape: f32[2,16,16,128], index: 3, kind: output, shape index: {0}]   ;;  %s4936_s4 = inlined_call_operand.vmem [shape: f32[2,2,2,128], index: 4, kind: output, shape index: {1}]  }
   0x1   :  { %s3901_s17 = smov 0   ;;  %s3903_s18 = smov 0  }
   0x2   :  { %s3905_s19 = smov 0  }
   0x3 LB: > { %s24_s20 = sadd.s32 1, %s3862_s17  ;;  %s27_s21 = sadd.s32 1, %s3866_s18  ;;  %s3870_s19 = sphi %s3905_s19, %s15_s19   ;;  %s3866_s18 = sphi %s3903_s18, %s4945_s18   ;;  %s3862_s17 = sphi %s3901_s17, %s4944_s17   ;;  %s3858_s16 = sphi %s3899_s16, %s4943_s16   ;;  %s3854_s15 = sphi %s3897_s15, %s4942_s15  }
   0x4   : > { %p25_p0 = scmp.ge.s32.totalorder %s24_s20, 2  ;;  %p2411_p1 = scmp.ge.s32.totalorder %s3870_s19, 1 }
   0x5   : > { %p225_p2 = scmp.lt.s32.totalorder %s3870_s19, 5 }
   0x6   : > { %s4947_s20 = smov (%p25_p0, %s24_s20), 0  ;;  %s4949_s21 = smov (!%p25_p0, %s27_s21), %s3866_s18 }
   0x7   : > { %p226_p3 = pnand %p2411_p1, %p225_p2  ;;  %p29_p4 = scmp.ge.s32.totalorder %s4949_s21, 2 }
   0x9   : > { %s4951_s21 = smov (%p29_p4, %s4949_s21), 0  ;;  %229 = sbr.rel (%p226_p3) target bundleno = 444 (0x1bc), region = 32 }
  0x10   : > { %v2423_v0 = vld [vmem:[%s4934_s2 + $0x80] sm:$0xff]  ;;  %v2424_v1 = vld [vmem:[%s4934_s2 + $0x88] sm:$0xff]  ;;  %s3941_s28 = sshll.u32 %s3854_s15, 3  ;;  %p292_p5 = scmp.lt.s32.totalorder %s3858_s16, 1  ;;  %v2425_v5 = vld [vmem:[%s4934_s2 + $0x90] sm:$0xff]  ;;  %vm411_vm0 = vcmask 1046528  }
  0x11   : > { %v2471_v2 = vld [vmem:[%s4934_s2 + $0x200] sm:$0xff]  ;;  %v3355_v3 = vpack.c.bf16 %v2424_v1, %v2423_v0  ;;  %v2472_v4 = vld [vmem:[%s4934_s2 + $0x208] sm:$0xff]  ;;  %v2426_v6 = vld [vmem:[%s4934_s2 + $0x98] sm:$0xff]  ;;  %p294_p6 = scmp.lt.s32.totalorder %s3941_s28, 17  ;;  %s2562_s10 = sadd.s32 8, %s3941_s28  ;;  %vm775_vm1 = vcmask 1045504  }
  0x12   : > { %v3483_v7 = vpack.c.bf16 %v2472_v4, %v2471_v2  ;;  %v3359_v8 = vpack.c.bf16 %v2426_v6, %v2425_v5  ;;  %v2473_v9 = vld [vmem:[%s4934_s2 + $0x210] sm:$0xff]  ;;  %v2474_v10 = vld [vmem:[%s4934_s2 + $0x218] sm:$0xff]  ;;  %v2427_v11 = vld [vmem:[%s4934_s2 + $0xa0] sm:$0xff]  ;;  %s4953_s16 = smov (!%p292_p5, %s3858_s16), 1  ;;  %p4112_p7 = scmp.lt.s32.totalorder %s2562_s10, 17  ;;  %vm2235_vm10 = vcmask 1040384  }
  0x13   : > { %3356 = vmatprep.subr.bf16.mxu1 %v3355_v3  ;;  %v3487_v12 = vpack.c.bf16 %v2474_v10, %v2473_v9  ;;  %v2428_v13 = vld [vmem:[%s4934_s2 + $0xa8] sm:$0xff]  ;;  %v2475_v14 = vld [vmem:[%s4934_s2 + $0x220] sm:$0xff]  ;;  %s295_s29 = scalar_select %p294_p6, %s3941_s28, 17  ;;  %v2429_v18 = vld [vmem:[%s4934_s2 + $0xb0] sm:$0xff] }
  0x14   : > { %v2476_v15 = vld [vmem:[%s4934_s2 + $0x228] sm:$0xff]  ;;  %3484 = vmatprep.subr.bf16.mxu0 %v3483_v7  ;;  %3358 = vmatpush3.bf16.msra.mxu1 %v3355_v3  ;;  %s3788_s30 = smul.u32 54, %s4953_s16  ;;  %v3363_v16 = vpack.c.bf16 %v2428_v13, %v2427_v11  ;;  %v2430_v19 = vld [vmem:[%s4934_s2 + $0xb8] sm:$0xff]  ;;  %v2477_v20 = vld [vmem:[%s4934_s2 + $0x230] sm:$0xff]  ;;  %s4955_s10 = smov (!%p4112_p7, %s2562_s10), 17 }
  0x15   : > { %3486 = vmatpush3.bf16.msra.mxu0 %v3483_v7  ;;  %3360 = vmatprep.subr.bf16.mxu1 %v3359_v8  ;;  %s3787_s5 = smul.u32 3, %s295_s29  ;;  %v3491_v17 = vpack.c.bf16 %v2476_v15, %v2475_v14  ;;  %v2478_v21 = vld [vmem:[%s4934_s2 + $0x238] sm:$0xff]  ;;  %v3367_v22 = vpack.c.bf16 %v2430_v19, %v2429_v18  ;;  %v2431_v23 = vld [vmem:[%s4934_s2 + $0xc0] sm:$0xff]  ;;  %v2432_v24 = vld [vmem:[%s4934_s2 + $0xc8] sm:$0xff]  ;;  %p325_p8 = scmp.lt.s32.totalorder %s3941_s28, 15 }
  0x16   : > { %3488 = vmatprep.subr.bf16.mxu0 %v3487_v12  ;;  %v3495_v25 = vpack.c.bf16 %v2478_v21, %v2477_v20  ;;  %v2479_v26 = vld [vmem:[%s4934_s2 + $0x240] sm:$0xff]  ;;  %v2480_v27 = vld [vmem:[%s4934_s2 + $0x248] sm:$0xff]  ;;  %v3371_v36 = vpack.c.bf16 %v2432_v24, %v2431_v23  ;;  %v2433_v38 = vld [vmem:[%s4934_s2 + $0xd0] sm:$0xff]  ;;  %s3789_s29 = smul.u32 3, %s4955_s10  ;;  %p335_p9 = scmp.lt.s32.totalorder %s3854_s15, 1 }
  0x17   : > { %s298_s14 = sadd.s32 %s3788_s30, %s3787_s5  ;;  %v3499_v37 = vpack.c.bf16 %v2480_v27, %v2479_v26  ;;  %v2434_v39 = vld [vmem:[%s4934_s2 + $0xd8] sm:$0xff]  ;;  %v2481_v42 = vld [vmem:[%s4934_s2 + $0x250] sm:$0xff]  ;;  %v2435_v46 = vld [vmem:[%s4934_s2 + $0xe0] sm:$0xff] }
  0x18   : > { %3362 = vmatpush3.bf16.msra.mxu1 %v3359_v8  ;;  %s2413_s22 = sshll.u32 %s298_s14, 3  ;;  %v2482_v43 = vld [vmem:[%s4934_s2 + $0x258] sm:$0xff]  ;;  %v3375_v44 = vpack.c.bf16 %v2434_v39, %v2433_v38  ;;  %v2436_v47 = vld [vmem:[%s4934_s2 + $0xe8] sm:$0xff]  ;;  %v2483_v48 = vld [vmem:[%s4934_s2 + $0x260] sm:$0xff]  ;;  %s4227_s12 = sadd.s32 %s3789_s29, %s3788_s30 }
  0x19   : > { %3490 = vmatpush3.bf16.msra.mxu0 %v3487_v12  ;;  %3364 = vmatprep.subr.bf16.mxu1 %v3363_v16  ;;  %s4000_s6 = scalar_lea.vmem %s4932_s0, %s2413_s22  ;;  %v3503_v45 = vpack.c.bf16 %v2482_v43, %v2481_v42  ;;  %v2484_v49 = vld [vmem:[%s4934_s2 + $0x268] sm:$0xff]  ;;  %v3379_v50 = vpack.c.bf16 %v2436_v47, %v2435_v46  ;;  %v2437_v52 = vld [vmem:[%s4934_s2 + $0xf0] sm:$0xff]  ;;  %v2438_v53 = vld [vmem:[%s4934_s2 + $0xf8] sm:$0xff]  ;;  %s2416_s23 = sshll.u32 %s4227_s12, 3 }
  0x1a   : > { %3492 = vmatprep.subr.bf16.mxu0 %v3491_v17  ;;  %v4009_v28 = vld [vmem:[%s4000_s6] sm:$0xff]  ;;  %v4012_v29 = vld [vmem:[%s4000_s6 + $0x8] sm:$0xff]  ;;  %v4016_v31 = vld [vmem:[%s4000_s6 + $0x18] sm:$0xff]  ;;  %v3507_v51 = vpack.c.bf16 %v2484_v49, %v2483_v48  ;;  %v3383_v56 = vpack.c.bf16 %v2438_v53, %v2437_v52  ;;  %s4288_s8 = scalar_lea.vmem %s4933_s1, %s2416_s23  ;;  %s2419_s22 = sshll.u32 %s4953_s16, 5 }
  0x1b   : > { %v412_v30 = vrot.slane %v4009_v28, 1  ;;  %v4019_v32 = vld [vmem:[%s4000_s6 + $0x20] sm:$0xff]  ;;  %v413_v33 = vrot.slane %v4012_v29, 1  ;;  %v417_v34 = vrot.slane %v4016_v31, 1  ;;  %v2485_v54 = vld [vmem:[%s4934_s2 + $0x270] sm:$0xff]  ;;  %v2486_v55 = vld [vmem:[%s4934_s2 + $0x278] sm:$0xff] }
  0x1c   : > { %3366 = vmatpush3.bf16.msra.mxu1 %v3363_v16  ;;  %v418_v35 = vrot.slane %v4019_v32, 1  ;;  %v4070_v57 = vld [vmem:[%s4000_s6 + $0x10] sm:$0x3]  ;;  %v3511_v58 = vpack.c.bf16 %v2486_v55, %v2485_v54  ;;  %v371_v59 = vld [vmem:[%s4934_s2] sm:$0xff]  ;;  %v372_v60 = vld [vmem:[%s4934_s2 + $0x8] sm:$0xff]  ;;  %v776_v47 = vrot.slane %v4009_v28, 2 }
  0x1d   : > { %3494 = vmatpush3.bf16.msra.mxu0 %v3491_v17  ;;  %3368 = vmatprep.subr.bf16.mxu1 %v3367_v22  ;;  %v414_v40 = vsel %vm411_vm0, %v412_v30, %v413_v33  ;;  %v4079_v61 = vld [vmem:[%s4000_s6 + $0x28] sm:$0x3]  ;;  %v2487_v62 = vld [vmem:[%s4934_s2 + $0x280] sm:$0xff]  ;;  %v415_v0 = vrot.slane %v4070_v57, 1  ;;  %v4089_v1 = vld [vmem:[%s4000_s6 + $0x30] sm:$0xff]  ;;  %v3387_v3 = vpack.c.bf16 %v372_v60, %v371_v59  ;;  %v777_v52 = vrot.slane %v4012_v29, 2 }
  0x1e   : > { %3496 = vmatprep.subr.bf16.mxu0 %v3495_v25  ;;  %v4036_v41 = vsel %vm411_vm0, %v417_v34, %v418_v35  ;;  %2883 = vmatprep.mubr.f32.mxu1 %v414_v40  ;;  %v2488_v63 = vld [vmem:[%s4934_s2 + $0x288] sm:$0xff]  ;;  %v4092_v2 = vld [vmem:[%s4000_s6 + $0x38] sm:$0xff]  ;;  %v420_v4 = vrot.slane %v4079_v61, 1  ;;  %v4097_v6 = vld [vmem:[%s4000_s6 + $0x40] sm:$0x3]  ;;  %v422_v7 = vrot.slane %v4089_v1, 1 }
  0x1f   : > { %3107 = vmatprep.mubr.f32.mxu0 %v4036_v41  ;;  %v3515_v5 = vpack.c.bf16 %v2488_v63, %v2487_v62  ;;  %v423_v8 = vrot.slane %v4092_v2, 1  ;;  %v373_v9 = vld [vmem:[%s4934_s2 + $0x10] sm:$0xff]  ;;  %v374_v10 = vld [vmem:[%s4934_s2 + $0x18] sm:$0xff]  ;;  %v416_v12 = vsel %vm411_vm0, %v413_v33, %v415_v0  ;;  %v4123_v14 = vld [vmem:[%s4000_s6 + $0x48] sm:$0xff]  ;;  %v425_v17 = vrot.slane %v4097_v6, 1  ;;  %s326_s14 = scalar_select %p325_p8, %s3941_s28, 15 }
  0x20   : > { %3370 = vmatpush3.bf16.msra.mxu1 %v3367_v22  ;;  %v2489_v11 = vld [vmem:[%s4934_s2 + $0x290] sm:$0xff]  ;;  %v2490_v13 = vld [vmem:[%s4934_s2 + $0x298] sm:$0xff]  ;;  %v421_v16 = vsel %vm411_vm0, %v418_v35, %v420_v4  ;;  %v3391_v18 = vpack.c.bf16 %v374_v10, %v373_v9  ;;  %v375_v19 = vld [vmem:[%s4934_s2 + $0x20] sm:$0xff]  ;;  %v427_v23 = vrot.slane %v4123_v14, 1  ;;  %v4230_v63 = vsel %vm775_vm1, %v776_v47, %v777_v52  ;;  %s4957_s15 = smov (!%p335_p9, %s3854_s15), 1 }
  0x21   : > { %3498 = vmatpush3.bf16.msra.mxu0 %v3495_v25  ;;  %3372 = vmatprep.subr.bf16.mxu1 %v3371_v36  ;;  %v4126_v15 = vld [vmem:[%s4000_s6 + $0x50] sm:$0xff]  ;;  %v4136_v20 = vld [vmem:[%s4000_s6 + $0x58] sm:$0x3]  ;;  %v4139_v21 = vsel %vm411_vm0, %v422_v7, %v423_v8  ;;  %v3519_v22 = vpack.c.bf16 %v2490_v13, %v2489_v11  ;;  %v376_v25 = vld [vmem:[%s4934_s2 + $0x28] sm:$0xff]  ;;  %v4166_v34 = vsel %vm411_vm0, %v423_v8, %v425_v17  ;;  %s2418_s30 = sshll.u32 %s326_s14, 1 }
  0x22   : > { %3500 = vmatprep.subr.bf16.mxu0 %v3499_v37  ;;  %v428_v24 = vrot.slane %v4126_v15, 1  ;;  %v4147_v26 = vld [vmem:[%s4000_s6 + $0x60] sm:$0xff]  ;;  %v4150_v27 = vld [vmem:[%s4000_s6 + $0x68] sm:$0xff]  ;;  %v430_v35 = vrot.slane %v4136_v20, 1  ;;  %v377_v39 = vld [vmem:[%s4934_s2 + $0x30] sm:$0xff]  ;;  %s329_s23 = sadd.s32 %s2419_s22, %s2418_s30 }
  0x23   : > { %v2491_v30 = vld [vmem:[%s4934_s2 + $0x2a0] sm:$0xff]  ;;  %v2492_v33 = vld [vmem:[%s4934_s2 + $0x2a8] sm:$0xff]  ;;  %v433_v38 = vrot.slane %v4150_v27, 1  ;;  %v4176_v40 = vld [vmem:[%s4000_s6 + $0x70] sm:$0x3]  ;;  %s2420_s24 = sshll.u32 %s329_s23, 3 }
  0x24   : > { %3374 = vmatpush3.bf16.msra.mxu1 %v3371_v36  ;;  %v3395_v36 = vpack.c.bf16 %v376_v25, %v375_v19  ;;  %v4180_v42 = vsel %vm411_vm0, %v427_v23, %v428_v24  ;;  %v3523_v43 = vpack.c.bf16 %v2492_v33, %v2491_v30  ;;  %v2494_v46 = vld [vmem:[%s4934_s2 + $0x2b8] sm:$0xff]  ;;  %v4198_v49 = vld [vmem:[%s4000_s6 + $0x80] sm:$0xff]  ;;  %v380_v60 = vld [vmem:[%s4934_s2 + $0x48] sm:$0xff]  ;;  %s4834_s27 = scalar_lea.vmem %s4935_s3, %s2420_s24 }
  0x25   : > { %3502 = vmatpush3.bf16.msra.mxu0 %v3499_v37  ;;  %3376 = vmatprep.subr.bf16.mxu1 %v3375_v44  ;;  %v432_v37 = vrot.slane %v4147_v26, 1  ;;  %v4195_v48 = vld [vmem:[%s4000_s6 + $0x78] sm:$0xff]  ;;  %v379_v59 = vld [vmem:[%s4934_s2 + $0x40] sm:$0xff]  ;;  %v4240_v4 = vld [vmem:[%s4000_s6 + $0x90] sm:$0xff] }
  0x26   : > { %3504 = vmatprep.subr.bf16.mxu0 %v3503_v45  ;;  %v2495_v62 = vld [vmem:[%s4934_s2 + $0x2c0] sm:$0xff]  ;;  %v3403_v9 = vpack.c.bf16 %v380_v60, %v379_v59  ;;  %v381_v10 = vld [vmem:[%s4934_s2 + $0x50] sm:$0xff]  ;;  %v4268_v19 = vld [vmem:[%s4000_s6 + $0xa8] sm:$0xff] }
  0x27   : > { %v4208_v53 = vsel %vm411_vm0, %v432_v37, %v433_v38  ;;  %v4255_v11 = vld [vmem:[%s4000_s6 + $0xa0] sm:$0x3]  ;;  %v2497_v23 = vld [vmem:[%s4934_s2 + $0x2d0] sm:$0xff] }
  0x28   : > { %3378 = vmatpush3.bf16.msra.mxu1 %v3375_v44  ;;  %v378_v44 = vld [vmem:[%s4934_s2 + $0x38] sm:$0xff]  ;;  %v445_v30 = vrot.slane %v4255_v11, 1  ;;  %v383_v37 = vld [vmem:[%s4934_s2 + $0x60] sm:$0xff] }
  0x29   : > { %3506 = vmatpush3.bf16.msra.mxu0 %v3503_v45  ;;  %3380 = vmatprep.subr.bf16.mxu1 %v3379_v50  ;;  %v2493_v45 = vld [vmem:[%s4934_s2 + $0x2b0] sm:$0xff]  ;;  %v3399_v54 = vpack.c.bf16 %v378_v44, %v377_v39  ;;  %v4300_v39 = vld [vmem:[%s4288_s8 + $0x18] sm:$0xff]  ;;  %v384_v44 = vld [vmem:[%s4934_s2 + $0x68] sm:$0xff] }
  0x2a   : > { %3508 = vmatprep.subr.bf16.mxu0 %v3507_v51  ;;  %v3527_v55 = vpack.c.bf16 %v2494_v46, %v2493_v45  ;;  %v2499_v45 = vld [vmem:[%s4934_s2 + $0x2e0] sm:$0xff]  ;;  %v1742_v46 = vrot.slane %v4300_v39, 1  ;;  %v1927_v47 = vrot.slane %v4300_v39, 2 }
  0x2c   : > { %3382 = vmatpush3.bf16.msra.mxu1 %v3379_v50  ;;  %v4202_v50 = vsel %vm411_vm0, %v428_v24, %v430_v35  ;;  %v2498_v24 = vld [vmem:[%s4934_s2 + $0x2d8] sm:$0xff]  ;;  %v447_v35 = vrot.slane %v4268_v19, 1 }
  0x2d   : > { %3510 = vmatpush3.bf16.msra.mxu0 %v3507_v51  ;;  %3384 = vmatprep.subr.bf16.mxu1 %v3383_v56  ;;  %v435_v51 = vrot.slane %v4176_v40, 1 }
  0x2e   : > { %3512 = vmatprep.subr.bf16.mxu0 %v3511_v58 }
  0x2f   : > { %v4247_v7 = vsel %vm411_vm0, %v433_v38, %v435_v51  ;;  %v4297_v38 = vld [vmem:[%s4000_s6 + $0xb8] sm:$0x3]  ;;  %v4315_v51 = vld [vmem:[%s4288_s8 + $0x20] sm:$0xff] }
  0x30   : > { %3386 = vmatpush3.bf16.msra.mxu1 %v3383_v56  ;;  %v4211_v56 = vld [vmem:[%s4000_s6 + $0x88] sm:$0x3]  ;;  %v450_v60 = vrot.slane %v4297_v38, 1 }
  0x31   : > { %3514 = vmatpush3.bf16.msra.mxu0 %v3511_v58  ;;  %3388 = vmatprep.subr.bf16.mxu1 %v3387_v3  ;;  %v438_v58 = vrot.slane %v4198_v49, 1  ;;  %v440_v8 = vrot.slane %v4211_v56, 1 }
  0x32   : > { %3516 = vmatprep.subr.bf16.mxu0 %v3515_v5 }
  0x33   : > { %2884 = vmatmul.mubr.f32.vlgmr.msra.gmra.mrb[0].mxu1 %v416_v12  ;;  %v4282_v25 = vsel %vm411_vm0, %v438_v58, %v440_v8  ;;  %v4339_v8 = vld [vmem:[%s4288_s8 + $0x10] sm:$0x3] }
  0x34   : > { %3108 = vmatmul.mubr.f32.vlgmr.msra.gmra.mrb[0].mxu0 %v421_v16  ;;  %3390 = vmatpush3.bf16.msra.mxu1 %v3387_v3  ;;  %v2496_v3 = vld [vmem:[%s4934_s2 + $0x2c8] sm:$0xff] }
  0x35   : > { %3518 = vmatpush3.bf16.msra.mxu0 %v3515_v5  ;;  %2886 = vmatprep.mubr.f32.mxu1 %v4036_v41  ;;  %v779_v41 = vrot.slane %v4070_v57, 2  ;;  %v437_v57 = vrot.slane %v4195_v48, 1  ;;  %v4243_v5 = vld [vmem:[%s4000_s6 + $0x98] sm:$0xff]  ;;  %v3531_v13 = vpack.c.bf16 %v2496_v3, %v2495_v62  ;;  %v3411_v3 = vpack.c.bf16 %v384_v44, %v383_v37  ;;  %v370_v44 = vld [vmem:[%s4288_s8 + $0x28] sm:$0x3] }
  0x36   : > { %3110 = vmatprep.mubr.f32.mxu0 %v4139_v21  ;;  %3392 = vmatprep.subr.bf16.mxu1 %v3391_v18  ;;  %v443_v17 = vrot.slane %v4243_v5, 1  ;;  %v1194_v37 = vrot.slane %v4339_v8, 1 }
  0x37   : > { %2887 = vmatmul.mubr.f32.gmra.mrb[2].mxu1 %v421_v16  ;;  %3520 = vmatprep.subr.bf16.mxu0 %v3519_v22  ;;  %v4233_v0 = vsel %vm775_vm1, %v777_v52, %v779_v41  ;;  %v4260_v12 = vsel %vm411_vm0, %v437_v57, %v438_v58  ;;  %v442_v16 = vrot.slane %v4240_v4, 1  ;;  %v2500_v52 = vld [vmem:[%s4934_s2 + $0x2e8] sm:$0xff]  ;;  %v1743_v57 = vrot.slane %v4315_v51, 1 }
  0x38   : > { %3111 = vmatmul.mubr.f32.gmra.mrb[2].mxu0 %v4166_v34  ;;  %3394 = vmatpush3.bf16.msra.mxu1 %v3391_v18  ;;  %v382_v18 = vld [vmem:[%s4934_s2 + $0x58] sm:$0xff]  ;;  %v1928_v58 = vrot.slane %v4315_v51, 2  ;;  %v4331_v59 = vsel %vm411_vm0, %v443_v17, %v445_v30 }
  0x39   : > { %3522 = vmatpush3.bf16.msra.mxu0 %v3519_v22  ;;  %2889 = vmatprep.mubr.f32.mxu1 %v4139_v21  ;;  %v4271_v22 = vld [vmem:[%s4000_s6 + $0xb0] sm:$0xff]  ;;  %v3407_v33 = vpack.c.bf16 %v382_v18, %v381_v10  ;;  %v4304_v41 = vsel %vm411_vm0, %v442_v16, %v443_v17  ;;  %v3539_v10 = vpack.c.bf16 %v2500_v52, %v2499_v45  ;;  %v386_v18 = vld [vmem:[%s4934_s2 + $0x78] sm:$0xff]  ;;  %v1745_v45 = vrot.slane %v370_v44, 1 }
  0x3a   : > { %3113 = vmatprep.mubr.f32.mxu0 %v4180_v42  ;;  %3396 = vmatprep.subr.bf16.mxu1 %v3395_v36  ;;  %v385_v17 = vld [vmem:[%s4934_s2 + $0x70] sm:$0xff]  ;;  %v2502_v30 = vld [vmem:[%s4934_s2 + $0x2f8] sm:$0xff]  ;;  %v781_v52 = vrot.slane %v4016_v31, 2 }
  0x3b   : > { %2890 = vmatmul.mubr.f32.gmra.mrb[4].mxu1 %v4166_v34  ;;  %3524 = vmatprep.subr.bf16.mxu0 %v3523_v43 }
  0x3c   : > { %3114 = vmatmul.mubr.f32.gmra.mrb[4].mxu0 %v4202_v50  ;;  %3398 = vmatpush3.bf16.msra.mxu1 %v3395_v36  ;;  %v448_v36 = vrot.slane %v4271_v22, 1 }
  0x3d   : > { %3526 = vmatpush3.bf16.msra.mxu0 %v3523_v43  ;;  %2892 = vmatprep.mubr.f32.mxu1 %v4180_v42  ;;  %v3535_v43 = vpack.c.bf16 %v2498_v24, %v2497_v23  ;;  %v4354_v23 = vsel %vm775_vm1, %v1927_v47, %v1928_v58  ;;  %v2501_v24 = vld [vmem:[%s4934_s2 + $0x2f0] sm:$0xff] }
  0x3e   : > { %3116 = vmatprep.mubr.f32.mxu0 %v4208_v53  ;;  %3400 = vmatprep.subr.bf16.mxu1 %v3399_v54  ;;  %v4336_v62 = vsel %vm411_vm0, %v447_v35, %v448_v36  ;;  %4938 = vst [vmem:[#allocation2_spill] sm:$0xff] %v4354_v23  ;;  %v4365_v35 = vsel %vm411_vm0, %v448_v36, %v450_v60  ;;  %v782_v36 = vrot.slane %v4019_v32, 2  ;;  %v2439_v60 = vld [vmem:[%s4934_s2 + $0x100] sm:$0xff] }
  0x3f   : > { %2893 = vmatmul.mubr.f32.gmra.mrb[6].mxu1 %v4202_v50  ;;  %3528 = vmatprep.subr.bf16.mxu0 %v3527_v55 }
  0x40   : > { %3117 = vmatmul.mubr.f32.gmra.mrb[6].mxu0 %v4247_v7  ;;  %3402 = vmatpush3.bf16.msra.mxu1 %v3399_v54  ;;  %v4322_v54 = vld [vmem:[%s4288_s8] sm:$0xff] }
  0x41   : > { %3530 = vmatpush3.bf16.msra.mxu0 %v3527_v55  ;;  %2895 = vmatprep.mubr.f32.mxu1 %v4208_v53  ;;  %v4325_v55 = vld [vmem:[%s4288_s8 + $0x8] sm:$0xff] }
  0x42   : > { %3119 = vmatprep.mubr.f32.mxu0 %v4260_v12  ;;  %3404 = vmatprep.subr.bf16.mxu1 %v3403_v9  ;;  %v1192_v16 = vrot.slane %v4325_v55, 1 }
  0x43   : > { %2896 = vmatmul.mubr.f32.gmra.mrb[8].mxu1 %v4247_v7  ;;  %3532 = vmatprep.subr.bf16.mxu0 %v3531_v13 }
  0x44   : > { %3120 = vmatmul.mubr.f32.gmra.mrb[8].mxu0 %v4282_v25  ;;  %3406 = vmatpush3.bf16.msra.mxu1 %v3403_v9  ;;  %v4342_v9 = vsel %vm411_vm0, %v1742_v46, %v1743_v57  ;;  %v1930_v46 = vrot.slane %v370_v44, 2  ;;  %v784_v44 = vrot.slane %v4079_v61, 2  ;;  %v787_v61 = vrot.slane %v4092_v2, 2 }
  0x45   : > { %3534 = vmatpush3.bf16.msra.mxu0 %v3531_v13  ;;  %2898 = vmatprep.mubr.f32.mxu1 %v4260_v12  ;;  %v1191_v13 = vrot.slane %v4322_v54, 1 }
  0x46   : > { %3122 = vmatprep.mubr.f32.mxu0 %v4304_v41  ;;  %3408 = vmatprep.subr.bf16.mxu1 %v3407_v33 }
  0x47   : > { %2899 = vmatmul.mubr.f32.gmra.mrb[10].mxu1 %v4282_v25  ;;  %3536 = vmatprep.subr.bf16.mxu0 %v3535_v43  ;;  %v4372_v47 = vsel %vm411_vm0, %v1191_v13, %v1192_v16  ;;  %v2503_v13 = vld [vmem:[%s4934_s2 + $0x300] sm:$0xff] }
  0x48   : > { %3123 = vmatmul.mubr.f32.gmra.mrb[10].mxu0 %v4331_v59  ;;  %3410 = vmatpush3.bf16.msra.mxu1 %v3407_v33  ;;  %v3415_v33 = vpack.c.bf16 %v386_v18, %v385_v17  ;;  %v2440_v17 = vld [vmem:[%s4934_s2 + $0x108] sm:$0xff] }
  0x49   : > { %3538 = vmatpush3.bf16.msra.mxu0 %v3535_v43  ;;  %2901 = vmatprep.mubr.f32.mxu1 %v4304_v41  ;;  %v3543_v43 = vpack.c.bf16 %v2502_v30, %v2501_v24  ;;  %v2504_v18 = vld [vmem:[%s4934_s2 + $0x308] sm:$0xff]  ;;  %v4390_v24 = vsel %vm411_vm0, %v1743_v57, %v1745_v45  ;;  %v4393_v30 = vsel %vm775_vm1, %v1928_v58, %v1930_v46  ;;  %v786_v45 = vrot.slane %v4089_v1, 2  ;;  %v2506_v46 = vld [vmem:[%s4934_s2 + $0x318] sm:$0xff] }
  0x4a   : > { %3125 = vmatprep.mubr.f32.mxu0 %v4336_v62  ;;  %3412 = vmatprep.subr.bf16.mxu1 %v3411_v3  ;;  %4939 = vst [vmem:[#allocation3_spill] sm:$0xff] %v4393_v30  ;;  %v3419_v23 = vpack.c.bf16 %v2440_v17, %v2439_v60  ;;  %v4403_v57 = vsel %vm775_vm1, %v781_v52, %v782_v36  ;;  %v789_v60 = vrot.slane %v4097_v6, 2  ;;  %v2444_v6 = vld [vmem:[%s4934_s2 + $0x128] sm:$0xff]  ;;  %v1377_v30 = vrot.slane %v4325_v55, 2 }
  0x4b   : > { %2902 = vmatmul.mubr.f32.gmra.mrb[12].mxu1 %v4331_v59  ;;  %3540 = vmatprep.subr.bf16.mxu0 %v3539_v10  ;;  %v3547_v58 = vpack.c.bf16 %v2504_v18, %v2503_v13  ;;  %v4422_v52 = vsel %vm775_vm1, %v782_v36, %v784_v44  ;;  %v4428_v17 = vsel %vm775_vm1, %v786_v45, %v787_v61  ;;  %v2443_v36 = vld [vmem:[%s4934_s2 + $0x120] sm:$0xff]  ;;  %v2508_v18 = vld [vmem:[%s4934_s2 + $0x328] sm:$0xff]  ;;  %v794_v45 = vrot.slane %v4136_v20, 2  ;;  %v2446_v20 = vld [vmem:[%s4934_s2 + $0x138] sm:$0xff] }
  0x4c   : > { %3126 = vmatmul.mubr.f32.gmra.mrb[12].mxu0 %v4365_v35  ;;  %3414 = vmatpush3.bf16.msra.mxu1 %v3411_v3  ;;  %v4398_v3 = vsel %vm411_vm0, %v1192_v16, %v1194_v37  ;;  %v2442_v16 = vld [vmem:[%s4934_s2 + $0x118] sm:$0xff]  ;;  %v2505_v37 = vld [vmem:[%s4934_s2 + $0x310] sm:$0xff]  ;;  %v4447_v44 = vsel %vm775_vm1, %v787_v61, %v789_v60  ;;  %v799_v60 = vrot.slane %v4176_v40, 2  ;;  %v2448_v40 = vld [vmem:[%s4934_s2 + $0x148] sm:$0xff] }
  0x4d   : > { %3542 = vmatpush3.bf16.msra.mxu0 %v3539_v10  ;;  %2904 = vmatprep.mubr.f32.mxu1 %v4336_v62  ;;  %v2441_v10 = vld [vmem:[%s4934_s2 + $0x110] sm:$0xff]  ;;  %v3551_v13 = vpack.c.bf16 %v2506_v46, %v2505_v37  ;;  %v2510_v37 = vld [vmem:[%s4934_s2 + $0x338] sm:$0xff] }
  0x4e   : > { %3128 = vmatprep.mubr.f32.mxu0 %v4372_v47  ;;  %3416 = vmatprep.subr.bf16.mxu1 %v3415_v33  ;;  %v2445_v61 = vld [vmem:[%s4934_s2 + $0x130] sm:$0xff] }
  0x4f   : > { %2905 = vmatmul.mubr.f32.gmra.mrb[14].mxu1 %v4365_v35  ;;  %3544 = vmatprep.subr.bf16.mxu0 %v3543_v43 }
  0x50   : > { %3129 = vmatmul.mubr.f32.gmra.mrb[14].mxu0 %v4398_v3  ;;  %3418 = vmatpush3.bf16.msra.mxu1 %v3415_v33  ;;  %v3423_v33 = vpack.c.bf16 %v2442_v16, %v2441_v10 }
  0x51   : > { %3546 = vmatpush3.bf16.msra.mxu0 %v3543_v43  ;;  %2939 = vmatprep.mubr.f32.mxu1 %v4009_v28  ;;  %v791_v43 = vrot.slane %v4123_v14, 2  ;;  %v792_v28 = vrot.slane %v4126_v15, 2 }
  0x52   : > { %3163 = vmatprep.mubr.f32.mxu0 %v4403_v57  ;;  %3420 = vmatprep.subr.bf16.mxu1 %v3419_v23 }
  0x53   : > { %2940 = vmatmul.mubr.f32.vlgmr.msra.gmra.mrb[0].mxu1 %v4012_v29  ;;  %3548 = vmatprep.subr.bf16.mxu0 %v3547_v58  ;;  %v2507_v29 = vld [vmem:[%s4934_s2 + $0x320] sm:$0xff]  ;;  %v4453_v10 = vsel %vm775_vm1, %v791_v43, %v792_v28  ;;  %v4472_v46 = vsel %vm775_vm1, %v792_v28, %v794_v45 }
  0x54   : > { %3164 = vmatmul.mubr.f32.vlgmr.msra.gmra.mrb[0].mxu0 %v4422_v52  ;;  %3422 = vmatpush3.bf16.msra.mxu1 %v3419_v23  ;;  %v3427_v23 = vpack.c.bf16 %v2444_v6, %v2443_v36  ;;  %v3555_v16 = vpack.c.bf16 %v2508_v18, %v2507_v29  ;;  %v802_v6 = vrot.slane %v4198_v49, 2  ;;  %v2447_v28 = vld [vmem:[%s4934_s2 + $0x140] sm:$0xff]  ;;  %v2512_v18 = vld [vmem:[%s4934_s2 + $0x348] sm:$0xff] }
  0x55   : > { %3550 = vmatpush3.bf16.msra.mxu0 %v3547_v58  ;;  %2942 = vmatprep.mubr.f32.mxu1 %v4016_v31  ;;  %v796_v58 = vrot.slane %v4147_v26, 2  ;;  %v797_v31 = vrot.slane %v4150_v27, 2  ;;  %v2511_v29 = vld [vmem:[%s4934_s2 + $0x340] sm:$0xff] }
  0x56   : > { %3166 = vmatprep.mubr.f32.mxu0 %v4428_v17  ;;  %3424 = vmatprep.subr.bf16.mxu1 %v3423_v33 }
  0x57   : > { %2943 = vmatmul.mubr.f32.gmra.mrb[2].mxu1 %v4019_v32  ;;  %3552 = vmatprep.subr.bf16.mxu0 %v3551_v13  ;;  %v2509_v32 = vld [vmem:[%s4934_s2 + $0x330] sm:$0xff]  ;;  %v4478_v43 = vsel %vm775_vm1, %v796_v58, %v797_v31  ;;  %v4497_v45 = vsel %vm775_vm1, %v797_v31, %v799_v60  ;;  %v804_v58 = vrot.slane %v4211_v56, 2  ;;  %v2450_v56 = vld [vmem:[%s4934_s2 + $0x158] sm:$0xff] }
  0x58   : > { %3167 = vmatmul.mubr.f32.gmra.mrb[2].mxu0 %v4447_v44  ;;  %3426 = vmatpush3.bf16.msra.mxu1 %v3423_v33  ;;  %v3431_v33 = vpack.c.bf16 %v2446_v20, %v2445_v61  ;;  %v3559_v36 = vpack.c.bf16 %v2510_v37, %v2509_v32  ;;  %v3563_v20 = vpack.c.bf16 %v2512_v18, %v2511_v29  ;;  %v807_v32 = vrot.slane %v4243_v5, 2  ;;  %v2449_v31 = vld [vmem:[%s4934_s2 + $0x150] sm:$0xff]  ;;  %v2514_v60 = vld [vmem:[%s4934_s2 + $0x358] sm:$0xff] }
  0x59   : > { %3554 = vmatpush3.bf16.msra.mxu0 %v3551_v13  ;;  %2945 = vmatprep.mubr.f32.mxu1 %v4089_v1  ;;  %v801_v13 = vrot.slane %v4195_v48, 2  ;;  %v2513_v37 = vld [vmem:[%s4934_s2 + $0x350] sm:$0xff]  ;;  %v812_v18 = vrot.slane %v4271_v22, 2 }
  0x5a   : > { %3169 = vmatprep.mubr.f32.mxu0 %v4453_v10  ;;  %3428 = vmatprep.subr.bf16.mxu1 %v3427_v23  ;;  %v3567_v29 = vpack.c.bf16 %v2514_v60, %v2513_v37 }
  0x5b   : > { %2946 = vmatmul.mubr.f32.gmra.mrb[4].mxu1 %v4092_v2  ;;  %3556 = vmatprep.subr.bf16.mxu0 %v3555_v16  ;;  %v4503_v61 = vsel %vm775_vm1, %v801_v13, %v802_v6  ;;  %v4522_v13 = vsel %vm775_vm1, %v802_v6, %v804_v58  ;;  %v2451_v6 = vld [vmem:[%s4934_s2 + $0x160] sm:$0xff] }
  0x5c   : > { %3170 = vmatmul.mubr.f32.gmra.mrb[4].mxu0 %v4472_v46  ;;  %3430 = vmatpush3.bf16.msra.mxu1 %v3427_v23  ;;  %v3435_v23 = vpack.c.bf16 %v2448_v40, %v2447_v28  ;;  %v809_v28 = vrot.slane %v4255_v11, 2  ;;  %v2452_v11 = vld [vmem:[%s4934_s2 + $0x168] sm:$0xff]  ;;  %v2515_v58 = vld [vmem:[%s4934_s2 + $0x360] sm:$0xff] }
  0x5d   : > { %3558 = vmatpush3.bf16.msra.mxu0 %v3555_v16  ;;  %2948 = vmatprep.mubr.f32.mxu1 %v4123_v14  ;;  %v806_v16 = vrot.slane %v4240_v4, 2 }
  0x5e   : > { %3172 = vmatprep.mubr.f32.mxu0 %v4478_v43  ;;  %3432 = vmatprep.subr.bf16.mxu1 %v3431_v33 }
  0x5f   : > { %2949 = vmatmul.mubr.f32.gmra.mrb[6].mxu1 %v4126_v15  ;;  %3560 = vmatprep.subr.bf16.mxu0 %v3559_v36  ;;  %v4528_v40 = vsel %vm775_vm1, %v806_v16, %v807_v32  ;;  %v2516_v16 = vld [vmem:[%s4934_s2 + $0x368] sm:$0xff] }
  0x60   : > { %3173 = vmatmul.mubr.f32.gmra.mrb[6].mxu0 %v4497_v45  ;;  %3434 = vmatpush3.bf16.msra.mxu1 %v3431_v33  ;;  %v3439_v33 = vpack.c.bf16 %v2450_v56, %v2449_v31  ;;  %v4547_v31 = vsel %vm775_vm1, %v807_v32, %v809_v28  ;;  %v814_v56 = vrot.slane %v4297_v38, 2  ;;  %v3571_v60 = vpack.c.bf16 %v2516_v16, %v2515_v58  ;;  %v2453_v32 = vld [vmem:[%s4934_s2 + $0x170] sm:$0xff]  ;;  %v2454_v38 = vld [vmem:[%s4934_s2 + $0x178] sm:$0xff] }
  0x61   : > { %3562 = vmatpush3.bf16.msra.mxu0 %v3559_v36  ;;  %2951 = vmatprep.mubr.f32.mxu1 %v4147_v26  ;;  %v811_v36 = vrot.slane %v4268_v19, 2  ;;  %v2517_v28 = vld [vmem:[%s4934_s2 + $0x370] sm:$0xff] }
  0x62   : > { %3175 = vmatprep.mubr.f32.mxu0 %v4503_v61  ;;  %3436 = vmatprep.subr.bf16.mxu1 %v3435_v23 }
  0x63   : > { %2952 = vmatmul.mubr.f32.gmra.mrb[8].mxu1 %v4150_v27  ;;  %3564 = vmatprep.subr.bf16.mxu0 %v3563_v20  ;;  %v4553_v37 = vsel %vm775_vm1, %v811_v36, %v812_v18  ;;  %v2518_v36 = vld [vmem:[%s4934_s2 + $0x378] sm:$0xff] }
  0x64   : > { %3176 = vmatmul.mubr.f32.gmra.mrb[8].mxu0 %v4522_v13  ;;  %3438 = vmatpush3.bf16.msra.mxu1 %v3435_v23  ;;  %v3443_v23 = vpack.c.bf16 %v2452_v11, %v2451_v6  ;;  %v4572_v6 = vsel %vm775_vm1, %v812_v18, %v814_v56  ;;  %v1379_v11 = vrot.slane %v4339_v8, 2  ;;  %v3575_v16 = vpack.c.bf16 %v2518_v36, %v2517_v28  ;;  %v2456_v18 = vld [vmem:[%s4934_s2 + $0x188] sm:$0xff]  ;;  %v2519_v8 = vld [vmem:[%s4934_s2 + $0x380] sm:$0xff]  ;;  %v2522_v28 = vld [vmem:[%s4934_s2 + $0x398] sm:$0xff] }
  0x65   : > { %3566 = vmatpush3.bf16.msra.mxu0 %v3563_v20  ;;  %2954 = vmatprep.mubr.f32.mxu1 %v4195_v48  ;;  %v1376_v20 = vrot.slane %v4322_v54, 2  ;;  %v2520_v56 = vld [vmem:[%s4934_s2 + $0x388] sm:$0xff] }
  0x66   : > { %3178 = vmatprep.mubr.f32.mxu0 %v4528_v40  ;;  %3440 = vmatprep.subr.bf16.mxu1 %v3439_v33 }
  0x67   : > { %2955 = vmatmul.mubr.f32.gmra.mrb[10].mxu1 %v4198_v49  ;;  %3568 = vmatprep.subr.bf16.mxu0 %v3567_v29  ;;  %v4578_v58 = vsel %vm775_vm1, %v1376_v20, %v1377_v30  ;;  %v4595_v20 = vsel %vm775_vm1, %v1377_v30, %v1379_v11  ;;  %v2521_v30 = vld [vmem:[%s4934_s2 + $0x390] sm:$0xff] }
  0x68   : > { %3179 = vmatmul.mubr.f32.gmra.mrb[10].mxu0 %v4547_v31  ;;  %3442 = vmatpush3.bf16.msra.mxu1 %v3439_v33  ;;  %v3447_v33 = vpack.c.bf16 %v2454_v38, %v2453_v32  ;;  %v2457_v38 = vld [vmem:[%s4934_s2 + $0x190] sm:$0xff]  ;;  %v3583_v11 = vpack.c.bf16 %v2522_v28, %v2521_v30  ;;  %v2527_v30 = vld [vmem:[%s4934_s2 + $0x3c0] sm:$0xff]  ;;  %v2528_v28 = vld [vmem:[%s4934_s2 + $0x3c8] sm:$0xff] }
  0x69   : > { %3570 = vmatpush3.bf16.msra.mxu0 %v3567_v29  ;;  %2957 = vmatprep.mubr.f32.mxu1 %v4240_v4  ;;  %v2455_v29 = vld [vmem:[%s4934_s2 + $0x180] sm:$0xff] }
  0x6a   : > { %3181 = vmatprep.mubr.f32.mxu0 %v4553_v37  ;;  %3444 = vmatprep.subr.bf16.mxu1 %v3443_v23  ;;  %v3451_v32 = vpack.c.bf16 %v2456_v18, %v2455_v29  ;;  %v2460_v29 = vld [vmem:[%s4934_s2 + $0x1a8] sm:$0xff] }
  0x6b   : > { %2958 = vmatmul.mubr.f32.gmra.mrb[12].mxu1 %v4243_v5  ;;  %3572 = vmatprep.subr.bf16.mxu0 %v3571_v60 }
  0x6c   : > { %3182 = vmatmul.mubr.f32.gmra.mrb[12].mxu0 %v4572_v6  ;;  %3446 = vmatpush3.bf16.msra.mxu1 %v3443_v23  ;;  %v3579_v23 = vpack.c.bf16 %v2520_v56, %v2519_v8  ;;  %v2461_v8 = vld [vmem:[%s4934_s2 + $0x1b0] sm:$0xff]  ;;  %v2462_v56 = vld [vmem:[%s4934_s2 + $0x1b8] sm:$0xff] }
  0x6d   : > { %3574 = vmatpush3.bf16.msra.mxu0 %v3571_v60  ;;  %2960 = vmatprep.mubr.f32.mxu1 %v4268_v19  ;;  %v2458_v60 = vld [vmem:[%s4934_s2 + $0x198] sm:$0xff] }
  0x6e   : > { %3184 = vmatprep.mubr.f32.mxu0 %v4578_v58  ;;  %3448 = vmatprep.subr.bf16.mxu1 %v3447_v33  ;;  %v3455_v36 = vpack.c.bf16 %v2458_v60, %v2457_v38  ;;  %v2463_v38 = vld [vmem:[%s4934_s2 + $0x1c0] sm:$0xff]  ;;  %v2464_v60 = vld [vmem:[%s4934_s2 + $0x1c8] sm:$0xff] }
  0x6f   : > { %2961 = vmatmul.mubr.f32.gmra.mrb[14].mxu1 %v4271_v22  ;;  %3576 = vmatprep.subr.bf16.mxu0 %v3575_v16 }
  0x70   : > { %3185 = vmatmul.mubr.f32.gmra.mrb[14].mxu0 %v4595_v20  ;;  %3450 = vmatpush3.bf16.msra.mxu1 %v3447_v33  ;;  %v2459_v33 = vld [vmem:[%s4934_s2 + $0x1a0] sm:$0xff] }
  0x71   : > { %3578 = vmatpush3.bf16.msra.mxu0 %v3575_v16  ;;  %2995 = vmatprep.mubr.f32.mxu1 %v4230_v63  ;;  %v2523_v63 = vld [vmem:[%s4934_s2 + $0x3a0] sm:$0xff]  ;;  %v3459_v16 = vpack.c.bf16 %v2460_v29, %v2459_v33  ;;  %v2465_v33 = vld [vmem:[%s4934_s2 + $0x1d0] sm:$0xff]  ;;  %v2466_v29 = vld [vmem:[%s4934_s2 + $0x1d8] sm:$0xff] }
  0x72   : > { %3219 = vmatprep.mubr.f32.mxu0 %v4089_v1  ;;  %3452 = vmatprep.subr.bf16.mxu1 %v3451_v32 }
  0x73   : > { %2996 = vmatmul.mubr.f32.vlgmr.msra.gmra.mrb[0].mxu1 %v4233_v0  ;;  %3580 = vmatprep.subr.bf16.mxu0 %v3579_v23  ;;  %v2524_v0 = vld [vmem:[%s4934_s2 + $0x3a8] sm:$0xff] }
  0x74   : > { %3220 = vmatmul.mubr.f32.vlgmr.msra.gmra.mrb[0].mxu0 %v4092_v2  ;;  %3454 = vmatpush3.bf16.msra.mxu1 %v3451_v32  ;;  %v3587_v18 = vpack.c.bf16 %v2524_v0, %v2523_v63  ;;  %v3463_v32 = vpack.c.bf16 %v2462_v56, %v2461_v8  ;;  %v2529_v63 = vld [vmem:[%s4934_s2 + $0x3d0] sm:$0xff]  ;;  %v2530_v0 = vld [vmem:[%s4934_s2 + $0x3d8] sm:$0xff]  ;;  %v2467_v8 = vld [vmem:[%s4934_s2 + $0x1e0] sm:$0xff] }
  0x75   : > { %3582 = vmatpush3.bf16.msra.mxu0 %v3579_v23  ;;  %2998 = vmatprep.mubr.f32.mxu1 %v4403_v57  ;;  %v2525_v57 = vld [vmem:[%s4934_s2 + $0x3b0] sm:$0xff]  ;;  %v2468_v56 = vld [vmem:[%s4934_s2 + $0x1e8] sm:$0xff] }
  0x76   : > { %3222 = vmatprep.mubr.f32.mxu0 %v4123_v14  ;;  %3456 = vmatprep.subr.bf16.mxu1 %v3455_v36 }
  0x77   : > { %2999 = vmatmul.mubr.f32.gmra.mrb[2].mxu1 %v4422_v52  ;;  %3584 = vmatprep.subr.bf16.mxu0 %v3583_v11  ;;  %v2526_v52 = vld [vmem:[%s4934_s2 + $0x3b8] sm:$0xff] }
  0x78   : > { %3223 = vmatmul.mubr.f32.gmra.mrb[2].mxu0 %v4126_v15  ;;  %3458 = vmatpush3.bf16.msra.mxu1 %v3455_v36  ;;  %v3591_v23 = vpack.c.bf16 %v2526_v52, %v2525_v57  ;;  %v3467_v36 = vpack.c.bf16 %v2464_v60, %v2463_v38  ;;  %v2531_v57 = vld [vmem:[%s4934_s2 + $0x3e0] sm:$0xff]  ;;  %v2532_v52 = vld [vmem:[%s4934_s2 + $0x3e8] sm:$0xff]  ;;  %v2469_v38 = vld [vmem:[%s4934_s2 + $0x1f0] sm:$0xff] }
  0x79   : > { %3586 = vmatpush3.bf16.msra.mxu0 %v3583_v11  ;;  %3001 = vmatprep.mubr.f32.mxu1 %v4428_v17  ;;  %v3595_v11 = vpack.c.bf16 %v2528_v28, %v2527_v30  ;;  %v2470_v60 = vld [vmem:[%s4934_s2 + $0x1f8] sm:$0xff]  ;;  %v2533_v30 = vld [vmem:[%s4934_s2 + $0x3f0] sm:$0xff] }
  0x7a   : > { %3225 = vmatprep.mubr.f32.mxu0 %v4147_v26  ;;  %3460 = vmatprep.subr.bf16.mxu1 %v3459_v16  ;;  %v2534_v28 = vld [vmem:[%s4934_s2 + $0x3f8] sm:$0xff] }
  0x7b   : > { %3002 = vmatmul.mubr.f32.gmra.mrb[4].mxu1 %v4447_v44  ;;  %3588 = vmatprep.subr.bf16.mxu0 %v3587_v18 }
  0x7c   : > { %3226 = vmatmul.mubr.f32.gmra.mrb[4].mxu0 %v4150_v27  ;;  %3462 = vmatpush3.bf16.msra.mxu1 %v3459_v16  ;;  %v3471_v16 = vpack.c.bf16 %v2466_v29, %v2465_v33  ;;  %v2535_v33 = vld [vmem:[%s4934_s2 + $0x400] sm:$0xff]  ;;  %v2536_v29 = vld [vmem:[%s4934_s2 + $0x408] sm:$0xff] }
  0x7d   : > { %3590 = vmatpush3.bf16.msra.mxu0 %v3587_v18  ;;  %3004 = vmatprep.mubr.f32.mxu1 %v4453_v10  ;;  %v3599_v18 = vpack.c.bf16 %v2530_v0, %v2529_v63  ;;  %v3611_v63 = vpack.c.bf16 %v2536_v29, %v2535_v33  ;;  %v2537_v0 = vld [vmem:[%s4934_s2 + $0x410] sm:$0xff] }
  0x7e   : > { %3228 = vmatprep.mubr.f32.mxu0 %v4195_v48  ;;  %3464 = vmatprep.subr.bf16.mxu1 %v3463_v32 }
  0x7f   : > { %3005 = vmatmul.mubr.f32.gmra.mrb[6].mxu1 %v4472_v46  ;;  %3592 = vmatprep.subr.bf16.mxu0 %v3591_v23 }
  0x80   : > { %3229 = vmatmul.mubr.f32.gmra.mrb[6].mxu0 %v4198_v49  ;;  %3466 = vmatpush3.bf16.msra.mxu1 %v3463_v32  ;;  %v3475_v32 = vpack.c.bf16 %v2468_v56, %v2467_v8  ;;  %v3831_v8 = vld [vmem:[%s4000_s6 + $0x20] sm:$0xff] }
  0x81   : > { %3594 = vmatpush3.bf16.msra.mxu0 %v3591_v23  ;;  %3007 = vmatprep.mubr.f32.mxu1 %v4478_v43  ;;  %v3603_v23 = vpack.c.bf16 %v2532_v52, %v2531_v57  ;;  %v2539_v56 = vld [vmem:[%s4934_s2 + $0x420] sm:$0xff]  ;;  %v2540_v57 = vld [vmem:[%s4934_s2 + $0x428] sm:$0xff]  ;;  %v2542_v52 = vld [vmem:[%s4934_s2 + $0x438] sm:$0xff] }
  0x82   : > { %3231 = vmatprep.mubr.f32.mxu0 %v4240_v4  ;;  %3468 = vmatprep.subr.bf16.mxu1 %v3467_v36 }
  0x83   : > { %3008 = vmatmul.mubr.f32.gmra.mrb[8].mxu1 %v4497_v45  ;;  %3596 = vmatprep.subr.bf16.mxu0 %v3595_v11 }
  0x84   : > { %3232 = vmatmul.mubr.f32.gmra.mrb[8].mxu0 %v4243_v5  ;;  %3470 = vmatpush3.bf16.msra.mxu1 %v3467_v36  ;;  %v3479_v36 = vpack.c.bf16 %v2470_v60, %v2469_v38 }
  0x85   : > { %3598 = vmatpush3.bf16.msra.mxu0 %v3595_v11  ;;  %3010 = vmatprep.mubr.f32.mxu1 %v4503_v61  ;;  %v3607_v11 = vpack.c.bf16 %v2534_v28, %v2533_v30  ;;  %v4837_v30 = vstv %s3941_s28  ;;  %s2421_s28 = sshll.u32 %s4953_s16, 1 }
  0x86   : > { %3234 = vmatprep.mubr.f32.mxu0 %v4268_v19  ;;  %3472 = vmatprep.subr.bf16.mxu1 %v3471_v16  ;;  %vm2137_vm2 = vcmp.lt.s32.totalorder %v4837_v30, 16  ;;  %v2130_v29 = vadd.s32 1, %v4837_v30  ;;  %s338_s29 = sadd.s32 %s2421_s28, %s4957_s15 }
  0x87   : > { %3011 = vmatmul.mubr.f32.gmra.mrb[10].mxu1 %v4522_v13  ;;  %3600 = vmatprep.subr.bf16.mxu0 %v3599_v18  ;;  %s2422_s10 = sshll.u32 %s338_s29, 1 }
  0x88   : > { %3235 = vmatmul.mubr.f32.gmra.mrb[10].mxu0 %v4271_v22  ;;  %3474 = vmatpush3.bf16.msra.mxu1 %v3471_v16  ;;  %v2538_v16 = vld [vmem:[%s4934_s2 + $0x418] sm:$0xff]  ;;  %vm2138_vm3 = vcmp.lt.s32.totalorder %v2130_v29, 16  ;;  %s340_s9 = scalar_lea.vmem %s4936_s4, %s2422_s10 }
  0x89   : > { %3602 = vmatpush3.bf16.msra.mxu0 %v3599_v18  ;;  %3013 = vmatprep.mubr.f32.mxu1 %v4528_v40  ;;  %v3830_v18 = vld [vmem:[%s4000_s6 + $0x18] sm:$0xff] }
  0x8a   : > { %3237 = vmatprep.mubr.f32.mxu0 %v4322_v54  ;;  %3476 = vmatprep.subr.bf16.mxu1 %v3475_v32 }
  0x8b   : > { %3014 = vmatmul.mubr.f32.gmra.mrb[12].mxu1 %v4547_v31  ;;  %3604 = vmatprep.subr.bf16.mxu0 %v3603_v23 }
  0x8c   : > { %3238 = vmatmul.mubr.f32.gmra.mrb[12].mxu0 %v4325_v55  ;;  %3478 = vmatpush3.bf16.msra.mxu1 %v3475_v32 }
  0x8d   : > { %3606 = vmatpush3.bf16.msra.mxu0 %v3603_v23  ;;  %3016 = vmatprep.mubr.f32.mxu1 %v4553_v37 }
  0x8e   : > { %3240 = vmatprep.mubr.f32.mxu0 %v4300_v39  ;;  %3480 = vmatprep.subr.bf16.mxu1 %v3479_v36  ;;  %v3615_v39 = vpack.c.bf16 %v2538_v16, %v2537_v0 }
  0x8f   : > { %3017 = vmatmul.mubr.f32.gmra.mrb[14].mxu1 %v4572_v6  ;;  %3608 = vmatprep.subr.bf16.mxu0 %v3607_v11 }
  0x90   : > { %3241 = vmatmul.mubr.f32.gmra.mrb[14].mxu0 %v4315_v51  ;;  %3482 = vmatpush3.bf16.msra.mxu1 %v3479_v36  ;;  %v2541_v51 = vld [vmem:[%s4934_s2 + $0x430] sm:$0xff] }
  0x91   : > { %3610 = vmatpush3.bf16.msra.mxu0 %v3607_v11  ;;  %3051 = vmatprep.mubr.f32.mxu1 %v3830_v18 }
  0x92   : > { %3275 = vmatprep.mubr.f32.mxu0 %v4139_v21  ;;  %3612 = vmatprep.subr.bf16.mxu0 %v3611_v63  ;;  %v3619_v21 = vpack.c.bf16 %v2540_v57, %v2539_v56  ;;  %v2131_v56 = vadd.s32 2, %v4837_v30 }
  0x93   : > { %3052 = vmatmul.mubr.f32.vlgmr.msra.gmra.mrb[0].mxu1 %v3831_v8  ;;  %3643 = vmatprep.subr.bf16.mxu1 %v3611_v63 }
  0x94   : > { %3276 = vmatmul.mubr.f32.vlgmr.msra.gmra.mrb[0].mxu0 %v4166_v34  ;;  %3651 = vmatpush3.bf16.msra.mxu1 %v3611_v63  ;;  %v2544_v34 = vld [vmem:[%s4934_s2 + $0x448] sm:$0xff]  ;;  %vm2139_vm4 = vcmp.lt.s32.totalorder %v2131_v56, 16 }
  0x95   : > { %3614 = vmatpush3.bf16.msra.mxu0 %v3611_v63  ;;  %3054 = vmatprep.mubr.f32.mxu1 %v4089_v1  ;;  %v3623_v1 = vpack.c.bf16 %v2542_v52, %v2541_v51 }
  0x96   : > { %3278 = vmatprep.mubr.f32.mxu0 %v4180_v42  ;;  %3616 = vmatprep.subr.bf16.mxu0 %v3615_v39  ;;  %v2546_v42 = vld [vmem:[%s4934_s2 + $0x458] sm:$0xff] }
  0x97   : > { %3055 = vmatmul.mubr.f32.gmra.mrb[2].mxu1 %v4092_v2  ;;  %3644 = vmatprep.subr.bf16.mxu1 %v3615_v39  ;;  %v2543_v2 = vld [vmem:[%s4934_s2 + $0x440] sm:$0xff] }
  0x98   : > { %3279 = vmatmul.mubr.f32.gmra.mrb[2].mxu0 %v4202_v50  ;;  %3652 = vmatpush3.bf16.msra.mxu1 %v3615_v39  ;;  %v2548_v50 = vld [vmem:[%s4934_s2 + $0x468] sm:$0xff] }
  0x99   : > { %3618 = vmatpush3.bf16.msra.mxu0 %v3615_v39  ;;  %3057 = vmatprep.mubr.f32.mxu1 %v4123_v14  ;;  %v3627_v14 = vpack.c.bf16 %v2544_v34, %v2543_v2 }
  0x9a   : > { %3281 = vmatprep.mubr.f32.mxu0 %v4208_v53  ;;  %3620 = vmatprep.subr.bf16.mxu0 %v3619_v21  ;;  %v2550_v53 = vld [vmem:[%s4934_s2 + $0x478] sm:$0xff] }
  0x9b   : > { %3058 = vmatmul.mubr.f32.gmra.mrb[4].mxu1 %v4126_v15  ;;  %3645 = vmatprep.subr.bf16.mxu1 %v3619_v21  ;;  %v2545_v15 = vld [vmem:[%s4934_s2 + $0x450] sm:$0xff] }
  0x9c   : > { %3282 = vmatmul.mubr.f32.gmra.mrb[4].mxu0 %v4247_v7  ;;  %3653 = vmatpush3.bf16.msra.mxu1 %v3619_v21  ;;  %v4941_v7 = vld [vmem:[#allocation3_spill] sm:$0xff] }
  0x9d   : > { %3622 = vmatpush3.bf16.msra.mxu0 %v3619_v21  ;;  %3060 = vmatprep.mubr.f32.mxu1 %v4147_v26  ;;  %v3631_v26 = vpack.c.bf16 %v2546_v42, %v2545_v15 }
  0x9e   : > { %3284 = vmatprep.mubr.f32.mxu0 %v4260_v12  ;;  %3624 = vmatprep.subr.bf16.mxu0 %v3623_v1 }
  0x9f   : > { %3061 = vmatmul.mubr.f32.gmra.mrb[6].mxu1 %v4150_v27  ;;  %3646 = vmatprep.subr.bf16.mxu1 %v3623_v1  ;;  %v2547_v27 = vld [vmem:[%s4934_s2 + $0x460] sm:$0xff] }
  0xa0   : > { %3285 = vmatmul.mubr.f32.gmra.mrb[6].mxu0 %v4282_v25  ;;  %3654 = vmatpush3.bf16.msra.mxu1 %v3623_v1 }
  0xa1   : > { %3626 = vmatpush3.bf16.msra.mxu0 %v3623_v1  ;;  %3063 = vmatprep.mubr.f32.mxu1 %v4195_v48  ;;  %v3635_v48 = vpack.c.bf16 %v2548_v50, %v2547_v27 }
  0xa2   : > { %3287 = vmatprep.mubr.f32.mxu0 %v4304_v41  ;;  %3628 = vmatprep.subr.bf16.mxu0 %v3627_v14 }
  0xa3   : > { %3064 = vmatmul.mubr.f32.gmra.mrb[8].mxu1 %v4198_v49  ;;  %3647 = vmatprep.subr.bf16.mxu1 %v3627_v14  ;;  %v2549_v49 = vld [vmem:[%s4934_s2 + $0x470] sm:$0xff] }
  0xa4   : > { %3288 = vmatmul.mubr.f32.gmra.mrb[8].mxu0 %v4331_v59  ;;  %3655 = vmatpush3.bf16.msra.mxu1 %v3627_v14 }
  0xa5   : > { %3630 = vmatpush3.bf16.msra.mxu0 %v3627_v14  ;;  %3066 = vmatprep.mubr.f32.mxu1 %v4240_v4  ;;  %v3639_v4 = vpack.c.bf16 %v2550_v53, %v2549_v49 }
  0xa6   : > { %3290 = vmatprep.mubr.f32.mxu0 %v4336_v62  ;;  %3632 = vmatprep.subr.bf16.mxu0 %v3631_v26 }
  0xa7   : > { %3067 = vmatmul.mubr.f32.gmra.mrb[10].mxu1 %v4243_v5  ;;  %3648 = vmatprep.subr.bf16.mxu1 %v3631_v26  ;;  %v4940_v5 = vld [vmem:[#allocation2_spill] sm:$0xff] }
  0xa8   : > { %3291 = vmatmul.mubr.f32.gmra.mrb[10].mxu0 %v4365_v35  ;;  %3656 = vmatpush3.bf16.msra.mxu1 %v3631_v26 }
  0xa9   : > { %3634 = vmatpush3.bf16.msra.mxu0 %v3631_v26  ;;  %3069 = vmatprep.mubr.f32.mxu1 %v4268_v19 }
  0xaa   : > { %3293 = vmatprep.mubr.f32.mxu0 %v4372_v47  ;;  %3636 = vmatprep.subr.bf16.mxu0 %v3635_v48 }
  0xab   : > { %3070 = vmatmul.mubr.f32.gmra.mrb[12].mxu1 %v4271_v22  ;;  %3649 = vmatprep.subr.bf16.mxu1 %v3635_v48 }
  0xac   : > { %3294 = vmatmul.mubr.f32.gmra.mrb[12].mxu0 %v4398_v3  ;;  %3657 = vmatpush3.bf16.msra.mxu1 %v3635_v48 }
  0xad   : > { %3638 = vmatpush3.bf16.msra.mxu0 %v3635_v48  ;;  %3072 = vmatprep.mubr.f32.mxu1 %v4322_v54 }
  0xae   : > { %3296 = vmatprep.mubr.f32.mxu0 %v4342_v9  ;;  %3640 = vmatprep.subr.bf16.mxu0 %v3639_v4 }
  0xaf   : > { %3073 = vmatmul.mubr.f32.gmra.mrb[14].mxu1 %v4325_v55  ;;  %3650 = vmatprep.subr.bf16.mxu1 %v3639_v4 }
  0xb0   : > { %3297 = vmatmul.mubr.f32.gmra.mrb[14].mxu0 %v4390_v24  ;;  %3658 = vmatpush3.bf16.msra.mxu1 %v3639_v4 }
  0xb1   : > { %3642 = vmatpush3.bf16.msra.mxu0 %v3639_v4  ;;  %3331 = vmatprep.mubr.f32.mxu0 %v4428_v17 }
  0xb2   : > { %3343 = vmatprep.mubr.f32.mxu1 %v4528_v40 }
  0xb3   : > { %3344 = vmatmul.mubr.f32.vlgmr.msra.gmra.mrb[16].mxu1 %v4547_v31 }
  0xb4   : > { %3332 = vmatmul.mubr.f32.vlgmr.msra.gmra.mrb[0].mxu0 %v4447_v44  ;;  %3346 = vmatprep.mubr.f32.mxu1 %v4553_v37 }
  0xb5   : > { %3334 = vmatprep.mubr.f32.mxu0 %v4453_v10 }
  0xb7   : > { %3347 = vmatmul.mubr.f32.gmra.mrb[18].mxu1 %v4572_v6 }
  0xb8   : > { %3335 = vmatmul.mubr.f32.gmra.mrb[2].mxu0 %v4472_v46  ;;  %3349 = vmatprep.mubr.f32.mxu1 %v4578_v58 }
  0xb9   : > { %3337 = vmatprep.mubr.f32.mxu0 %v4478_v43 }
  0xbb   : > { %3350 = vmatmul.mubr.f32.gmra.mrb[20].mxu1 %v4595_v20 }
  0xbc   : > { %3338 = vmatmul.mubr.f32.gmra.mrb[4].mxu0 %v4497_v45  ;;  %3352 = vmatprep.mubr.f32.mxu1 %v4940_v5 }
  0xbd   : > { %3340 = vmatprep.mubr.f32.mxu0 %v4503_v61 }
  0xbf   : > { %3353 = vmatmul.mubr.f32.gmra.mrb[22].mxu1 %v4941_v7  ;;  %v2132_v7 = vadd.s32 3, %v4837_v30 }
  0xc0   : > { %3341 = vmatmul.mubr.f32.gmra.mrb[6].mxu0 %v4522_v13 }
  0xc1   : > { %vm2140_vm5 = vcmp.lt.s32.totalorder %v2132_v7, 16 }
 0x166   : > { %v3053_v12 = vpop.f32.mrb[0].mxu1 }
 0x167   : > { %v1093_v19 = vpop.f32.mrb[1].mxu1 }
 0x16a   : > { %v4812_v22 = vpop.f32.mrb[2].mxu1 }
 0x16b   : > { %v4814_v25 = vpop.f32.mrb[3].mxu1 }
 0x16e   : > { %v4816_v41 = vpop.f32.mrb[4].mxu1 }
 0x16f   : > { %v4818_v54 = vpop.f32.mrb[5].mxu1 }
 0x172   : > { %v4820_v55 = vpop.f32.mrb[6].mxu1 }
 0x173   : > { %v4822_v59 = vpop.f32.mrb[7].mxu1 }
 0x176   : > { %v3065_v62 = vpop.f32.mrb[8].mxu1 }
 0x177   : > { %v3289_v9 = vpop.f32.mrb[8].mxu0  ;;  %v1133_v35 = vpop.f32.mrb[9].mxu1 }
 0x178   : > { %v3667_v47 = vadd.f32 %v3289_v9, %v3065_v62  ;;  %v1872_v24 = vpop.f32.mrb[9].mxu0  ;;  %v2133_v9 = vadd.s32 4, %v4837_v30 }
 0x179   : > { %v3669_v3 = vadd.f32 %v1872_v24, %v1133_v35 }
 0x17a   : > { %v3068_v17 = vpop.f32.mrb[10].mxu1  ;;  %vm2141_vm6 = vcmp.lt.s32.totalorder %v2133_v9, 16 }
 0x17b   : > { %v3292_v44 = vpop.f32.mrb[10].mxu0  ;;  %v1143_v10 = vpop.f32.mrb[11].mxu1 }
 0x17c   : > { %v3671_v46 = vadd.f32 %v3292_v44, %v3068_v17  ;;  %v1882_v43 = vpop.f32.mrb[11].mxu0 }
 0x17d   : > { %v3673_v45 = vadd.f32 %v1882_v43, %v1143_v10 }
 0x17e   : > { %v3071_v61 = vpop.f32.mrb[12].mxu1 }
 0x17f   : > { %v3295_v13 = vpop.f32.mrb[12].mxu0  ;;  %v1153_v40 = vpop.f32.mrb[13].mxu1 }
 0x180   : > { %v3675_v31 = vadd.f32 %v3295_v13, %v3071_v61  ;;  %v1892_v37 = vpop.f32.mrb[13].mxu0 }
 0x181   : > { %v3677_v6 = vadd.f32 %v1892_v37, %v1153_v40 }
 0x182   : > { %v3074_v58 = vpop.f32.mrb[14].mxu1 }
 0x183   : > { %v3298_v20 = vpop.f32.mrb[14].mxu0  ;;  %v1163_v32 = vpop.f32.mrb[15].mxu1 }
 0x184   : > { %v4827_v23 = vadd.f32 %v3298_v20, %v3074_v58  ;;  %v1902_v38 = vpop.f32.mrb[15].mxu0 }
 0x185   : > { %v4829_v60 = vadd.f32 %v1902_v38, %v1163_v32 }
 0x186   : > { %v3345_v28 = vpop.f32.mrb[16].mxu1 }
 0x187   : > { %v3333_v36 = vpop.f32.mrb[0].mxu0  ;;  %v4840_v11 = vadd.f32 %v3667_v47, %v3345_v28  ;;  %v2057_v33 = vpop.f32.mrb[17].mxu1 }
 0x188   : > { %v3659_v63 = vadd.f32 %v3333_v36, %v3053_v12  ;;  %v2017_v0 = vpop.f32.mrb[1].mxu0  ;;  %v4843_v16 = vadd.f32 %v3669_v3, %v2057_v33 }
 0x189   : > { %2121 = vst [vmem:[%s4834_s27 + $0x48] sm:$0xff] %v4840_v11  ;;  %v3660_v18 = vadd.f32 %v2017_v0, %v1093_v19  ;;  %v2170_v0 = vsel %vm2141_vm6, %v4840_v11, 0.0 }
 0x18a   : > { %2113 = vst [vmem:[%s4834_s27 + $0x8] sm:$0xff] %v3659_v63  ;;  %v2162_v39 = vsel %vm2137_vm2, %v3659_v63, 0.0  ;;  %2120 = vst [vmem:[%s4834_s27 + $0x40] sm:$0xff] %v4843_v16  ;;  %v3348_v8 = vpop.f32.mrb[18].mxu1 }
 0x18b   : > { %v2199_v57 = vmul.f32 %v3659_v63, %v2162_v39  ;;  %2112 = vst [vmem:[%s4834_s27] sm:$0xff] %v3660_v18  ;;  %v2161_v21 = vsel %vm2137_vm2, %v3660_v18, 0.0  ;;  %v3336_v51 = vpop.f32.mrb[2].mxu0  ;;  %v4856_v52 = vadd.f32 %v3671_v46, %v3348_v8  ;;  %v2067_v1 = vpop.f32.mrb[19].mxu1 }
 0x18c   : > { %v2177_v2 = vadd.f32 %v2162_v39, %v2161_v21  ;;  %v2198_v34 = vmul.f32 %v3660_v18, %v2161_v21  ;;  %v3661_v14 = vadd.f32 %v3336_v51, %v4812_v22  ;;  %v2027_v15 = vpop.f32.mrb[3].mxu0  ;;  %v4859_v42 = vadd.f32 %v3673_v45, %v2067_v1 }
 0x18d   : > { %2123 = vst [vmem:[%s4834_s27 + $0x58] sm:$0xff] %v4856_v52  ;;  %v3662_v26 = vadd.f32 %v2027_v15, %v4814_v25  ;;  %v2136_v21 = vadd.s32 7, %v4837_v30 }
 0x18e   : > { %v2214_v27 = vadd.f32 %v2199_v57, %v2198_v34  ;;  %2115 = vst [vmem:[%s4834_s27 + $0x18] sm:$0xff] %v3661_v14  ;;  %2122 = vst [vmem:[%s4834_s27 + $0x50] sm:$0xff] %v4859_v42  ;;  %v3351_v50 = vpop.f32.mrb[20].mxu1  ;;  %v2164_v48 = vsel %vm2138_vm3, %v3661_v14, 0.0  ;;  %v2207_v57 = vmul.f32 %v4840_v11, %v2170_v0 }
 0x18f   : > { %2114 = vst [vmem:[%s4834_s27 + $0x10] sm:$0xff] %v3662_v26  ;;  %v2163_v49 = vsel %vm2138_vm3, %v3662_v26, 0.0  ;;  %v3339_v53 = vpop.f32.mrb[4].mxu0  ;;  %v4870_v4 = vadd.f32 %v3675_v31, %v3351_v50  ;;  %v2077_v5 = vpop.f32.mrb[21].mxu1  ;;  %v2201_v47 = vmul.f32 %v3661_v14, %v2164_v48  ;;  %vm2144_vm9 = vcmp.lt.s32.totalorder %v2136_v21, 16 }
 0x190   : > { %v2178_v12 = vadd.f32 %v2177_v2, %v2163_v49  ;;  %v2200_v19 = vmul.f32 %v3662_v26, %v2163_v49  ;;  %v3663_v22 = vadd.f32 %v3339_v53, %v4816_v41  ;;  %v2037_v25 = vpop.f32.mrb[5].mxu0  ;;  %v4874_v62 = vadd.f32 %v3677_v6, %v2077_v5 }
 0x191   : > { %2125 = vst [vmem:[%s4834_s27 + $0x68] sm:$0xff] %v4870_v4  ;;  %v3664_v35 = vadd.f32 %v2037_v25, %v4818_v54  ;;  %v2134_v6 = vadd.s32 5, %v4837_v30 }
 0x192   : > { %v2215_v24 = vadd.f32 %v2214_v27, %v2200_v19  ;;  %2117 = vst [vmem:[%s4834_s27 + $0x28] sm:$0xff] %v3663_v22  ;;  %v2179_v3 = vadd.f32 %v2178_v12, %v2164_v48  ;;  %2124 = vst [vmem:[%s4834_s27 + $0x60] sm:$0xff] %v4874_v62  ;;  %v3354_v17 = vpop.f32.mrb[22].mxu1  ;;  %v2166_v44 = vsel %vm2139_vm4, %v3663_v22, 0.0 }
 0x193   : > { %2116 = vst [vmem:[%s4834_s27 + $0x20] sm:$0xff] %v3664_v35  ;;  %v2165_v41 = vsel %vm2139_vm4, %v3664_v35, 0.0  ;;  %v3342_v10 = vpop.f32.mrb[6].mxu0  ;;  %v3680_v46 = vadd.f32 %v4827_v23, %v3354_v17  ;;  %v2087_v43 = vpop.f32.mrb[23].mxu1  ;;  %v2203_v58 = vmul.f32 %v3663_v22, %v2166_v44  ;;  %vm2142_vm7 = vcmp.lt.s32.totalorder %v2134_v6, 16 }
 0x194   : > { %v2180_v45 = vadd.f32 %v2179_v3, %v2165_v41  ;;  %v2202_v54 = vmul.f32 %v3664_v35, %v2165_v41  ;;  %v2216_v61 = vadd.f32 %v2215_v24, %v2201_v47  ;;  %v2047_v13 = vpop.f32.mrb[7].mxu0  ;;  %v3665_v40 = vadd.f32 %v3342_v10, %v4820_v55 }
 0x195   : > { %2127 = vst [vmem:[%s4834_s27 + $0x78] sm:$0xff] %v3680_v46  ;;  %v3666_v31 = vadd.f32 %v2047_v13, %v4822_v59  ;;  %v3682_v37 = vadd.f32 %v4829_v60, %v2087_v43  ;;  %v2169_v55 = vsel %vm2141_vm6, %v4843_v16, 0.0  ;;  %v2135_v59 = vadd.s32 6, %v4837_v30 }
 0x196   : > { %v2217_v20 = vadd.f32 %v2216_v61, %v2202_v54  ;;  %v2181_v32 = vadd.f32 %v2180_v45, %v2166_v44  ;;  %2119 = vst [vmem:[%s4834_s27 + $0x38] sm:$0xff] %v3665_v40  ;;  %v2168_v23 = vsel %vm2140_vm5, %v3665_v40, 0.0  ;;  %v2206_v18 = vmul.f32 %v4843_v16, %v2169_v55 }
 0x197   : > { %2118 = vst [vmem:[%s4834_s27 + $0x30] sm:$0xff] %v3666_v31  ;;  %v2167_v38 = vsel %vm2140_vm5, %v3666_v31, 0.0  ;;  %2126 = vst [vmem:[%s4834_s27 + $0x70] sm:$0xff] %v3682_v37  ;;  %v2205_v60 = vmul.f32 %v3665_v40, %v2168_v23  ;;  %v2171_v56 = vsel %vm2142_vm7, %v4859_v42, 0.0  ;;  %vm2143_vm8 = vcmp.lt.s32.totalorder %v2135_v59, 16 }
 0x198   : > { %v2182_v28 = vadd.f32 %v2181_v32, %v2167_v38  ;;  %v2204_v36 = vmul.f32 %v3666_v31, %v2167_v38  ;;  %v2218_v33 = vadd.f32 %v2217_v20, %v2203_v58  ;;  %v2172_v2 = vsel %vm2142_vm7, %v4856_v52, 0.0 }
 0x199   : > { %v2208_v34 = vmul.f32 %v4859_v42, %v2171_v56  ;;  %v2173_v26 = vsel %vm2143_vm8, %v4874_v62, 0.0  ;;  %v2209_v16 = vmul.f32 %v4856_v52, %v2172_v2  ;;  %v2174_v11 = vsel %vm2143_vm8, %v4870_v4, 0.0 }
 0x19a   : > { %v2183_v29 = vadd.f32 %v2182_v28, %v2168_v23  ;;  %v2219_v63 = vadd.f32 %v2218_v33, %v2204_v36  ;;  %v2210_v30 = vmul.f32 %v4874_v62, %v2173_v26  ;;  %v2175_v53 = vsel %vm2144_vm9, %v3682_v37, 0.0 }
 0x19b   : > { %v2211_v42 = vmul.f32 %v4870_v4, %v2174_v11  ;;  %v2176_v12 = vsel %vm2144_vm9, %v3680_v46, 0.0  ;;  %v2212_v52 = vmul.f32 %v3682_v37, %v2175_v53 }
 0x19c   : > { %v2184_v39 = vadd.f32 %v2183_v29, %v2169_v55  ;;  %v2220_v8 = vadd.f32 %v2219_v63, %v2205_v60  ;;  %v2213_v25 = vmul.f32 %v3680_v46, %v2176_v12 }
 0x19e   : > { %v2185_v51 = vadd.f32 %v2184_v39, %v2170_v0  ;;  %v2221_v1 = vadd.f32 %v2220_v8, %v2206_v18 }
 0x1a0   : > { %v2222_v14 = vadd.f32 %v2221_v1, %v2207_v57  ;;  %v2186_v15 = vadd.f32 %v2185_v51, %v2171_v56 }
 0x1a2   : > { %v2187_v27 = vadd.f32 %v2186_v15, %v2172_v2  ;;  %v2223_v50 = vadd.f32 %v2222_v14, %v2208_v34 }
 0x1a4   : > { %v2188_v48 = vadd.f32 %v2187_v27, %v2173_v26  ;;  %v2224_v49 = vadd.f32 %v2223_v50, %v2209_v16 }
 0x1a6   : > { %v2189_v5 = vadd.f32 %v2188_v48, %v2174_v11  ;;  %v2225_v7 = vadd.f32 %v2224_v49, %v2210_v30 }
 0x1a8   : > { %v2190_v19 = vadd.f32 %v2189_v5, %v2175_v53  ;;  %v2226_v22 = vadd.f32 %v2225_v7, %v2211_v42 }
 0x1aa   : > { %v2191_v9 = vadd.f32 %v2190_v19, %v2176_v12  ;;  %v2227_v35 = vadd.f32 %v2226_v22, %v2212_v52 }
 0x1ac   : > { %v2192_v47 = vrot.slane %v2191_v9, 4  ;;  %v2228_v24 = vadd.f32 %v2227_v35, %v2213_v25 }
 0x1ae   : > { %v2193_v62 = vadd.f32 %v2192_v47, %v2191_v9  ;;  %v2229_v3 = vrot.slane %v2228_v24, 4 }
 0x1b0   : > { %v2194_v17 = vrot.slane %v2193_v62, 2  ;;  %v2230_v44 = vadd.f32 %v2229_v3, %v2228_v24 }
 0x1b2   : > { %v2195_v4 = vadd.f32 %v2194_v17, %v2193_v62  ;;  %v2231_v41 = vrot.slane %v2230_v44, 2 }
 0x1b4   : > { %v2196_v10 = vrot.slane %v2195_v4, 1  ;;  %v2232_v43 = vadd.f32 %v2231_v41, %v2230_v44 }
 0x1b6   : > { %v2233_v45 = vrot.slane %v2232_v43, 1  ;;  %v2197_v46 = vadd.f32 %v2196_v10, %v2195_v4 }
 0x1b8   : > { %v2234_v54 = vadd.f32 %v2233_v45, %v2232_v43 }
 0x1ba   : > { %v2236_v61 = vsel %vm2235_vm10, %v2197_v46, %v2234_v54 }
 0x1bb   : > { %2237 = vst [vmem:[%s340_s9] sm:$0x3] %v2236_v61 }
 0x1bc PF: > { %s15_s19 = sadd.s32 1, %s3870_s19   ;;  %s4942_s15 = smov %s3862_s17 }
 0x1bd   : > { %p12_p10 = scmp.ge.s32.totalorder %s15_s19, 6   ;;  %s4943_s16 = smov %s3866_s18 }
 0x1be   : > { %s4944_s17 = smov %s4947_s20  ;;  %s4945_s18 = smov %s4951_s21 }
 0x1bf   :  { %14 = sbr.rel (!%p12_p10) target bundleno = 3 (0x3), region = 85 }

</bundles_post_ra>
